<compile_context>
chip_gen: v5e
topology: v5e:2x2
jax: 0.10.0
libtpu: 0.0.40
codegen_flags: <defaults>
</compile_context>

<pallas_src>
import functools

import jax
import jax.numpy as jnp
import numpy as np
from jax.experimental import pallas as pl
from jax.experimental.pallas import tpu as pltpu

_NEG_BIAS = -1e30  # finite large-negative mask bias (avoids -inf - -inf = NaN)


def _layer_norm(x, gamma, beta, eps=1e-5):
    mu = jnp.mean(x, axis=-1, keepdims=True)
    xc = x - mu
    var = jnp.mean(xc * xc, axis=-1, keepdims=True)
    return xc * jax.lax.rsqrt(var + eps) * gamma + beta


def _decoder_layer_kernel(
    x_ref, mem_ref, mask_ref,
    ca_g_ref, ca_b_ref,
    wq_ref, bq_ref, wkv_ref, bkv_ref, wo_ref, bo_ref,
    ff_g_ref, ff_b_ref,
    w1_ref, b1_ref, w2_ref, b2_ref,
    out_ref, attnw_ref,
    k_scr, v_scr,
    *, nhead,
):
    x = x_ref[0]          # (tq, D)  f32
    maskb = mask_ref[0]   # (1, M)   1.0 == valid token, 0.0 == padded

    Tq, D = x.shape
    M = maskb.shape[1]
    hd = D // nhead

    # ---- K/V projection: once per batch (query-tile 0), cached in VMEM ----
    @pl.when(pl.program_id(1) == 0)
    def _():
        mem_bf = mem_ref[0].astype(jnp.bfloat16)                    # (M, D)
        kv = jnp.dot(mem_bf, wkv_ref[...],
                     preferred_element_type=jnp.float32) + bkv_ref[...]
        k_scr[...] = kv[:, :D].astype(jnp.bfloat16)
        v_scr[...] = kv[:, D:].astype(jnp.bfloat16)

    # ---- cross-attention block on ca_norm(x), all heads batched ----
    y = _layer_norm(x, ca_g_ref[...], ca_b_ref[...])
    y_bf = y.astype(jnp.bfloat16)

    # Q projection (1/sqrt(hd) already folded into Wq/bq on the host).
    q = jnp.dot(y_bf, wq_ref[...], preferred_element_type=jnp.float32) + bq_ref[...]

    qh = q.reshape(Tq, nhead, hd).astype(jnp.bfloat16)   # (t, h, d)
    kh = k_scr[...].reshape(M, nhead, hd)                # (m, h, d) bf16
    vh = v_scr[...].reshape(M, nhead, hd)                # (m, h, d) bf16

    bias = jnp.where(maskb > 0.5, 0.0, _NEG_BIAS)        # (1, M), finite

    # One batched score matmul for all heads.
    s = jnp.einsum('thd,mhd->htm', qh, kh,
                   preferred_element_type=jnp.float32)    # (h, t, m)
    s = s + bias
    s = s - jnp.max(s, axis=-1, keepdims=True)
    p = jnp.exp(s)
    p = p * pl.reciprocal(jnp.sum(p, axis=-1, keepdims=True), approx=True)

    attnw_ref[0] = p                                      # single lane-dense slab store

    o = jnp.einsum('htm,mhd->thd', p.astype(jnp.bfloat16), vh,
                   preferred_element_type=jnp.float32)    # (t, h, d)
    attn = jnp.dot(o.reshape(Tq, D).astype(jnp.bfloat16), wo_ref[...],
                   preferred_element_type=jnp.float32) + bo_ref[...]

    x1 = x + attn                                         # residual (dropout = identity)

    # ---- feed-forward block ----
    z = _layer_norm(x1, ff_g_ref[...], ff_b_ref[...])
    h1 = jnp.dot(z.astype(jnp.bfloat16), w1_ref[...],
                 preferred_element_type=jnp.float32) + b1_ref[...]
    h1 = jnp.maximum(h1, 0.0)                             # ReLU
    ff = jnp.dot(h1.astype(jnp.bfloat16), w2_ref[...],
                 preferred_element_type=jnp.float32) + b2_ref[...]

    out_ref[0] = (x1 + ff).astype(out_ref.dtype)


def _pick_tile(t):
    """Largest sublane-friendly tile (multiple of 8) dividing t, capped at 256."""
    for cand in (256, 128, 64, 32, 16, 8):
        if t % cand == 0:
            return cand
    return t  # fall back to whole sequence in one block


def decoder_layer_forward(x, memory, memory_mask, params, *, nhead, tq=None):
    """x: (B,T,D) target tokens, memory: (B,M,D), memory_mask: (B,M) 1==valid."""
    B, T, D = x.shape
    M = memory.shape[1]
    Dff = params["w1"].shape[1]
    hd = D // nhead
    if tq is None:
        tq = _pick_tile(T)
    assert T % tq == 0
    n_t = T // tq

    mask3 = memory_mask.reshape(B, 1, M).astype(jnp.float32)

    # Ship weights to the MXU in bf16 (f32 accumulation in-kernel); fold the
    # attention scale into Wq/bq once on the host.
    scale = 1.0 / float(np.sqrt(hd))
    bf = lambda a: a.astype(jnp.bfloat16)
    wq = bf(params["wq"] * scale)
    bq = params["bq"] * scale
    wkv = bf(jnp.concatenate([params["wk"], params["wv"]], axis=1))   # (D, 2D)
    bkv = jnp.concatenate([params["bk"], params["bv"]], axis=1)       # (1, 2D)
    wo = bf(params["wo"])
    w1 = bf(params["w1"])
    w2 = bf(params["w2"])

    def bspec_const(shape):
        n = len(shape)
        return pl.BlockSpec(shape, lambda b, t: (0,) * n)

    in_specs = [
        pl.BlockSpec((1, tq, D), lambda b, t: (b, t, 0)),        # x (T-tiled)
        pl.BlockSpec((1, M, D), lambda b, t: (b, 0, 0)),         # memory
        pl.BlockSpec((1, 1, M), lambda b, t: (b, 0, 0)),         # key padding mask
        bspec_const((1, D)), bspec_const((1, D)),                # ca_norm gamma/beta
        bspec_const((D, D)), bspec_const((1, D)),                # Wq, bq (pre-scaled)
        bspec_const((D, 2 * D)), bspec_const((1, 2 * D)),        # Wkv, bkv (fused)
        bspec_const((D, D)), bspec_const((1, D)),                # Wo, bo
        bspec_const((1, D)), bspec_const((1, D)),                # ff_norm gamma/beta
        bspec_const((D, Dff)), bspec_const((1, Dff)),            # W1, b1
        bspec_const((Dff, D)), bspec_const((1, D)),              # W2, b2
    ]
    out_specs = (
        pl.BlockSpec((1, tq, D), lambda b, t: (b, t, 0)),
        pl.BlockSpec((1, nhead, tq, M), lambda b, t: (b, 0, t, 0)),
    )
    out_shapes = (
        jax.ShapeDtypeStruct((B, T, D), jnp.float32),
        jax.ShapeDtypeStruct((B, nhead, T, M), jnp.float32),
    )

    kernel = functools.partial(_decoder_layer_kernel, nhead=nhead)
    return pl.pallas_call(
        kernel,
        out_shape=out_shapes,
        grid_spec=pltpu.PrefetchScalarGridSpec(
            num_scalar_prefetch=0,
            grid=(B, n_t),
            in_specs=in_specs,
            out_specs=out_specs,
            scratch_shapes=[
                pltpu.VMEM((M, D), jnp.bfloat16),   # cached K (per batch)
                pltpu.VMEM((M, D), jnp.bfloat16),   # cached V (per batch)
            ],
        ),
        compiler_params=pltpu.CompilerParams(
            # t-axis carries the per-batch K/V cache -> must run sequentially.
            dimension_semantics=("parallel", "arbitrary"),
            vmem_limit_bytes=64 * 1024 * 1024,
        ),
    )(
        x, memory, mask3,
        params["ca_gamma"], params["ca_beta"],
        wq, bq, wkv, bkv, wo, params["bo"],
        params["ff_gamma"], params["ff_beta"],
        w1, params["b1"], w2, params["b2"],
    )


def decoder_layer_reference(x, memory, memory_mask, params, *, nhead):
    """Pure-JAX f32 reference for correctness checking."""
    def ln(v, g, b):
        mu = v.mean(-1, keepdims=True)
        var = ((v - mu) ** 2).mean(-1, keepdims=True)
        return (v - mu) / jnp.sqrt(var + 1e-5) * g + b

    B, T, D = x.shape
    M = memory.shape[1]
    hd = D // nhead

    y = ln(x, params["ca_gamma"], params["ca_beta"])
    q = y @ params["wq"] + params["bq"]
    k = memory @ params["wk"] + params["bk"]
    v = memory @ params["wv"] + params["bv"]
    qh = q.reshape(B, T, nhead, hd).transpose(0, 2, 1, 3)
    kh = k.reshape(B, M, nhead, hd).transpose(0, 2, 1, 3)
    vh = v.reshape(B, M, nhead, hd).transpose(0, 2, 1, 3)
    s = jnp.einsum("bhtd,bhmd->bhtm", qh, kh) / np.sqrt(hd)
    bias = jnp.where(memory_mask > 0.5, 0.0, -jnp.inf)[:, None, None, :]
    p = jax.nn.softmax(s + bias, axis=-1)
    o = jnp.einsum("bhtm,bhmd->bhtd", p, vh).transpose(0, 2, 1, 3).reshape(B, T, D)
    attn = o @ params["wo"] + params["bo"]
    x1 = x + attn
    z = ln(x1, params["ff_gamma"], params["ff_beta"])
    h1 = jnp.maximum(z @ params["w1"] + params["b1"], 0.0)
    ff = h1 @ params["w2"] + params["b2"]
    return x1 + ff, p


def init_params(key, d_model, d_ff):
    ks = jax.random.split(key, 12)
    n = lambda k, shape, s=0.1: (s * jax.random.normal(k, shape)).astype(jnp.float32)
    return {
        "ca_gamma": jnp.ones((1, d_model), jnp.float32) + n(ks[0], (1, d_model), 0.01),
        "ca_beta": n(ks[1], (1, d_model), 0.01),
        "wq": n(ks[2], (d_model, d_model)), "bq": n(ks[3], (1, d_model), 0.01),
        "wk": n(ks[4], (d_model, d_model)), "bk": n(ks[5], (1, d_model), 0.01),
        "wv": n(ks[6], (d_model, d_model)), "bv": n(ks[7], (1, d_model), 0.01),
        "wo": n(ks[8], (d_model, d_model)), "bo": n(ks[9], (1, d_model), 0.01),
        "ff_gamma": jnp.ones((1, d_model), jnp.float32),
        "ff_beta": jnp.zeros((1, d_model), jnp.float32),
        "w1": n(ks[10], (d_model, d_ff)), "b1": jnp.zeros((1, d_ff), jnp.float32),
        "w2": n(ks[11], (d_ff, d_model)), "b2": jnp.zeros((1, d_model), jnp.float32),
    }


if __name__ == "__main__":
    # T=16 with tq=8 -> two query tiles per batch, exercising the per-batch
    # K/V cache-and-reuse path.
    B, T, M, D, NHEAD, DFF = 2, 16, 16, 32, 4, 64

    key = jax.random.PRNGKey(0)
    kx, kmem, kp = jax.random.split(key, 3)
    x = jax.random.normal(kx, (B, T, D), jnp.float32)
    memory = jax.random.normal(kmem, (B, M, D), jnp.float32)
    # key padding mask: 1 == valid, 0 == padded (last 3 memory tokens of batch 1 padded)
    memory_mask = jnp.ones((B, M), jnp.float32).at[1, M - 3:].set(0.0)

    params = init_params(kp, D, DFF)

    out, attn_w = decoder_layer_forward(x, memory, memory_mask, params,
                                        nhead=NHEAD, tq=8)
    out = jax.block_until_ready(out)
    attn_w = jax.block_until_ready(attn_w)

    ref_out, ref_w = decoder_layer_reference(x, memory, memory_mask, params, nhead=NHEAD)
    # bf16 MXU matmuls + approx reciprocal vs f32 reference -> relaxed tolerances.
    np.testing.assert_allclose(np.asarray(out), np.asarray(ref_out), rtol=5e-2, atol=5e-2)
    np.testing.assert_allclose(np.asarray(attn_w), np.asarray(ref_w), rtol=5e-2, atol=2e-2)

    print("KERNEL_OK")
</pallas_src>

<mosaic_0001>
module attributes {stable_mosaic.version = 11 : i64} {
  func.func @_decoder_layer_kernel(%arg0: i32, %arg1: i32, %arg2: memref<1x8x32xf32, #tpu.memory_space<vmem>>, %arg3: memref<1x16x32xf32, #tpu.memory_space<vmem>>, %arg4: memref<1x1x16xf32, #tpu.memory_space<vmem>>, %arg5: memref<1x32xf32, #tpu.memory_space<vmem>>, %arg6: memref<1x32xf32, #tpu.memory_space<vmem>>, %arg7: memref<32x32xbf16, #tpu.memory_space<vmem>>, %arg8: memref<1x32xf32, #tpu.memory_space<vmem>>, %arg9: memref<32x64xbf16, #tpu.memory_space<vmem>>, %arg10: memref<1x64xf32, #tpu.memory_space<vmem>>, %arg11: memref<32x32xbf16, #tpu.memory_space<vmem>>, %arg12: memref<1x32xf32, #tpu.memory_space<vmem>>, %arg13: memref<1x32xf32, #tpu.memory_space<vmem>>, %arg14: memref<1x32xf32, #tpu.memory_space<vmem>>, %arg15: memref<32x64xbf16, #tpu.memory_space<vmem>>, %arg16: memref<1x64xf32, #tpu.memory_space<vmem>>, %arg17: memref<64x32xbf16, #tpu.memory_space<vmem>>, %arg18: memref<1x32xf32, #tpu.memory_space<vmem>>, %arg19: memref<1x8x32xf32, #tpu.memory_space<vmem>>, %arg20: memref<1x4x8x16xf32, #tpu.memory_space<vmem>>, %arg21: memref<16x32xbf16, #tpu.memory_space<vmem>>, %arg22: memref<16x32xbf16, #tpu.memory_space<vmem>>) attributes {dimension_semantics = [#tpu.dimension_semantics<parallel>, #tpu.dimension_semantics<arbitrary>], iteration_bounds = array<i64: 2, 2>, scalar_prefetch = 0 : i64, scratch_operands = 2 : i64, tpu.core_type = #tpu.core_type<tc>, window_params = [{transform_indices = @transform_0, window_bounds = array<i64: 1, 8, 32>}, {transform_indices = @transform_1, window_bounds = array<i64: 1, 16, 32>}, {transform_indices = @transform_2, window_bounds = array<i64: 1, 1, 16>}, {pipeline_mode = #tpu.pipeline_mode<synchronous>, transform_indices = @transform_3, window_bounds = array<i64: 1, 32>}, {pipeline_mode = #tpu.pipeline_mode<synchronous>, transform_indices = @transform_4, window_bounds = array<i64: 1, 32>}, {pipeline_mode = #tpu.pipeline_mode<synchronous>, transform_indices = @transform_5, window_bounds = array<i64: 32, 32>}, {pipeline_mode = #tpu.pipeline_mode<synchronous>, transform_indices = @transform_6, window_bounds = array<i64: 1, 32>}, {pipeline_mode = #tpu.pipeline_mode<synchronous>, transform_indices = @transform_7, window_bounds = array<i64: 32, 64>}, {pipeline_mode = #tpu.pipeline_mode<synchronous>, transform_indices = @transform_8, window_bounds = array<i64: 1, 64>}, {pipeline_mode = #tpu.pipeline_mode<synchronous>, transform_indices = @transform_9, window_bounds = array<i64: 32, 32>}, {pipeline_mode = #tpu.pipeline_mode<synchronous>, transform_indices = @transform_10, window_bounds = array<i64: 1, 32>}, {pipeline_mode = #tpu.pipeline_mode<synchronous>, transform_indices = @transform_11, window_bounds = array<i64: 1, 32>}, {pipeline_mode = #tpu.pipeline_mode<synchronous>, transform_indices = @transform_12, window_bounds = array<i64: 1, 32>}, {pipeline_mode = #tpu.pipeline_mode<synchronous>, transform_indices = @transform_13, window_bounds = array<i64: 32, 64>}, {pipeline_mode = #tpu.pipeline_mode<synchronous>, transform_indices = @transform_14, window_bounds = array<i64: 1, 64>}, {pipeline_mode = #tpu.pipeline_mode<synchronous>, transform_indices = @transform_15, window_bounds = array<i64: 64, 32>}, {pipeline_mode = #tpu.pipeline_mode<synchronous>, transform_indices = @transform_16, window_bounds = array<i64: 1, 32>}, {transform_indices = @transform_17, window_bounds = array<i64: 1, 8, 32>}, {transform_indices = @transform_18, window_bounds = array<i64: 1, 4, 8, 16>}]} {
    %c0 = arith.constant 0 : index
    %c0_0 = arith.constant 0 : index
    %c0_1 = arith.constant 0 : index
    %0 = vector.load %arg2[%c0, %c0_0, %c0_1] : memref<1x8x32xf32, #tpu.memory_space<vmem>>, vector<1x8x32xf32>
    %1 = vector.shape_cast %0 : vector<1x8x32xf32> to vector<8x32xf32>
    %c0_2 = arith.constant 0 : index
    %c0_3 = arith.constant 0 : index
    %c0_4 = arith.constant 0 : index
    %2 = vector.load %arg4[%c0_2, %c0_3, %c0_4] : memref<1x1x16xf32, #tpu.memory_space<vmem>>, vector<1x1x16xf32>
    %3 = vector.shape_cast %2 : vector<1x1x16xf32> to vector<1x16xf32>
    %c0_i32 = arith.constant 0 : i32
    %4 = arith.cmpi eq, %arg1, %c0_i32 : i32
    %5 = arith.extui %4 : i1 to i32
    %c0_i32_5 = arith.constant 0 : i32
    %6 = arith.cmpi ne, %5, %c0_i32_5 : i32
    scf.if %6 {
      %c0_62 = arith.constant 0 : index
      %c0_63 = arith.constant 0 : index
      %c0_64 = arith.constant 0 : index
      %114 = vector.load %arg3[%c0_62, %c0_63, %c0_64] : memref<1x16x32xf32, #tpu.memory_space<vmem>>, vector<1x16x32xf32>
      %115 = vector.shape_cast %114 : vector<1x16x32xf32> to vector<16x32xf32>
      %116 = arith.truncf %115 : vector<16x32xf32> to vector<16x32xbf16>
      %c0_65 = arith.constant 0 : index
      %c0_66 = arith.constant 0 : index
      %117 = vector.load %arg9[%c0_65, %c0_66] : memref<32x64xbf16, #tpu.memory_space<vmem>>, vector<32x64xbf16>
      %cst_67 = arith.constant dense<0.000000e+00> : vector<16x64xf32>
      %118 = tpu.matmul %116, %117, %cst_67 {dimension_numbers = #tpu.dot_dimension_numbers<[1], [0], [0], [1], [0, 0, 1, 1], [], []>} : vector<16x32xbf16>, vector<32x64xbf16>, vector<16x64xf32> -> vector<16x64xf32>
      %c0_68 = arith.constant 0 : index
      %c0_69 = arith.constant 0 : index
      %119 = vector.load %arg10[%c0_68, %c0_69] : memref<1x64xf32, #tpu.memory_space<vmem>>, vector<1x64xf32>
      %120 = vector.broadcast %119 : vector<1x64xf32> to vector<16x64xf32>
      %121 = arith.addf %118, %120 : vector<16x64xf32>
      %122 = vector.extract_strided_slice %121 {offsets = [0, 0], sizes = [16, 32], strides = [1, 1]} : vector<16x64xf32> to vector<16x32xf32>
      %123 = arith.truncf %122 : vector<16x32xf32> to vector<16x32xbf16>
      %c0_70 = arith.constant 0 : index
      %c0_71 = arith.constant 0 : index
      %124 = vector.load %arg21[%c0_70, %c0_71] : memref<16x32xbf16, #tpu.memory_space<vmem>>, vector<16x32xbf16>
      tpu.vector_store %arg21[%c0_70, %c0_71], %123 {strides = array<i32>} : memref<16x32xbf16, #tpu.memory_space<vmem>>, vector<16x32xbf16>,
      %125 = vector.extract_strided_slice %121 {offsets = [0, 32], sizes = [16, 32], strides = [1, 1]} : vector<16x64xf32> to vector<16x32xf32>
      %126 = arith.truncf %125 : vector<16x32xf32> to vector<16x32xbf16>
      %c0_72 = arith.constant 0 : index
      %c0_73 = arith.constant 0 : index
      %127 = vector.load %arg22[%c0_72, %c0_73] : memref<16x32xbf16, #tpu.memory_space<vmem>>, vector<16x32xbf16>
      tpu.vector_store %arg22[%c0_72, %c0_73], %126 {strides = array<i32>} : memref<16x32xbf16, #tpu.memory_space<vmem>>, vector<16x32xbf16>,
    } else {
    }
    %c0_6 = arith.constant 0 : index
    %c0_7 = arith.constant 0 : index
    %7 = vector.load %arg5[%c0_6, %c0_7] : memref<1x32xf32, #tpu.memory_space<vmem>>, vector<1x32xf32>
    %c0_8 = arith.constant 0 : index
    %c0_9 = arith.constant 0 : index
    %8 = vector.load %arg6[%c0_8, %c0_9] : memref<1x32xf32, #tpu.memory_space<vmem>>, vector<1x32xf32>
    %cst = arith.constant dense<0.000000e+00> : vector<8xf32>
    %9 = vector.multi_reduction <add>, %1, %cst [1] : vector<8x32xf32> to vector<8xf32>
    %10 = vector.shape_cast %9 : vector<8xf32> to vector<8x1xf32>
    %cst_10 = arith.constant 3.200000e+01 : f32
    %11 = vector.broadcast %cst_10 : f32 to vector<8x1xf32>
    %12 = arith.divf %10, %11 : vector<8x1xf32>
    %13 = vector.broadcast %12 : vector<8x1xf32> to vector<8x32xf32>
    %14 = arith.subf %1, %13 : vector<8x32xf32>
    %15 = arith.mulf %14, %14 : vector<8x32xf32>
    %cst_11 = arith.constant dense<0.000000e+00> : vector<8xf32>
    %16 = vector.multi_reduction <add>, %15, %cst_11 [1] : vector<8x32xf32> to vector<8xf32>
    %17 = vector.shape_cast %16 : vector<8xf32> to vector<8x1xf32>
    %cst_12 = arith.constant 3.200000e+01 : f32
    %18 = vector.broadcast %cst_12 : f32 to vector<8x1xf32>
    %19 = arith.divf %17, %18 : vector<8x1xf32>
    %cst_13 = arith.constant 9.99999974E-6 : f32
    %20 = vector.broadcast %cst_13 : f32 to vector<8x1xf32>
    %21 = arith.addf %19, %20 : vector<8x1xf32>
    %22 = math.rsqrt %21 : vector<8x1xf32>
    %23 = vector.broadcast %22 : vector<8x1xf32> to vector<8x32xf32>
    %24 = arith.mulf %14, %23 : vector<8x32xf32>
    %25 = vector.broadcast %7 : vector<1x32xf32> to vector<8x32xf32>
    %26 = arith.mulf %24, %25 : vector<8x32xf32>
    %27 = vector.broadcast %8 : vector<1x32xf32> to vector<8x32xf32>
    %28 = arith.addf %26, %27 : vector<8x32xf32>
    %29 = arith.truncf %28 : vector<8x32xf32> to vector<8x32xbf16>
    %c0_14 = arith.constant 0 : index
    %c0_15 = arith.constant 0 : index
    %30 = vector.load %arg7[%c0_14, %c0_15] : memref<32x32xbf16, #tpu.memory_space<vmem>>, vector<32x32xbf16>
    %cst_16 = arith.constant dense<0.000000e+00> : vector<8x32xf32>
    %31 = tpu.matmul %29, %30, %cst_16 {dimension_numbers = #tpu.dot_dimension_numbers<[1], [0], [0], [1], [0, 0, 1, 1], [], []>} : vector<8x32xbf16>, vector<32x32xbf16>, vector<8x32xf32> -> vector<8x32xf32>
    %c0_17 = arith.constant 0 : index
    %c0_18 = arith.constant 0 : index
    %32 = vector.load %arg8[%c0_17, %c0_18] : memref<1x32xf32, #tpu.memory_space<vmem>>, vector<1x32xf32>
    %33 = vector.broadcast %32 : vector<1x32xf32> to vector<8x32xf32>
    %34 = arith.addf %31, %33 : vector<8x32xf32>
    %35 = vector.shape_cast %34 : vector<8x32xf32> to vector<8x4x8xf32>
    %36 = arith.truncf %35 : vector<8x4x8xf32> to vector<8x4x8xbf16>
    %c0_19 = arith.constant 0 : index
    %c0_20 = arith.constant 0 : index
    %37 = vector.load %arg21[%c0_19, %c0_20] : memref<16x32xbf16, #tpu.memory_space<vmem>>, vector<16x32xbf16>
    %38 = vector.shape_cast %37 : vector<16x32xbf16> to vector<16x4x8xbf16>
    %c0_21 = arith.constant 0 : index
    %c0_22 = arith.constant 0 : index
    %39 = vector.load %arg22[%c0_21, %c0_22] : memref<16x32xbf16, #tpu.memory_space<vmem>>, vector<16x32xbf16>
    %40 = vector.shape_cast %39 : vector<16x32xbf16> to vector<16x4x8xbf16>
    %cst_23 = arith.constant 5.000000e-01 : f32
    %41 = vector.broadcast %cst_23 : f32 to vector<1x16xf32>
    %42 = arith.cmpf ogt, %3, %41 : vector<1x16xf32>
    %cst_24 = arith.constant 0.000000e+00 : f32
    %cst_25 = arith.constant -1.000000e+30 : f32
    %43 = vector.broadcast %cst_24 : f32 to vector<1x16xf32>
    %44 = vector.broadcast %cst_25 : f32 to vector<1x16xf32>
    %45 = arith.select %42, %43, %44 : vector<1x16xi1>, vector<1x16xf32>
    "tpu.trace_start"() <{level = 10 : i32, message = "thd,mhd->htm"}> : () -> ()
    %cst_26 = arith.constant dense<0.000000e+00> : vector<4x8x16xf32>
    %46 = tpu.matmul %36, %38, %cst_26 {dimension_numbers = #tpu.dot_dimension_numbers<[2], [2], [0], [0], [0, 1, 0, 0, 1, 0], [1], [1]>} : vector<8x4x8xbf16>, vector<16x4x8xbf16>, vector<4x8x16xf32> -> vector<4x8x16xf32>
    "tpu.trace_stop"() : () -> ()
    %47 = vector.shape_cast %45 : vector<1x16xf32> to vector<1x1x16xf32>
    %48 = vector.broadcast %47 : vector<1x1x16xf32> to vector<4x8x16xf32>
    %49 = arith.addf %46, %48 : vector<4x8x16xf32>
    %cst_27 = arith.constant dense<0xFF800000> : vector<4x8xf32>
    %50 = vector.multi_reduction <maximumf>, %49, %cst_27 [2] : vector<4x8x16xf32> to vector<4x8xf32>
    %51 = vector.shape_cast %50 : vector<4x8xf32> to vector<4x8x1xf32>
    %52 = vector.broadcast %51 : vector<4x8x1xf32> to vector<4x8x16xf32>
    %53 = arith.subf %49, %52 : vector<4x8x16xf32>
    %54 = math.exp %53 : vector<4x8x16xf32>
    %cst_28 = arith.constant dense<0.000000e+00> : vector<4x8xf32>
    %55 = vector.multi_reduction <add>, %54, %cst_28 [2] : vector<4x8x16xf32> to vector<4x8xf32>
    %56 = vector.shape_cast %55 : vector<4x8xf32> to vector<4x8x1xf32>
    %57 = tpu.reciprocal %56 {approx = true} : vector<4x8x1xf32> -> vector<4x8x1xf32>
    %58 = vector.broadcast %57 : vector<4x8x1xf32> to vector<4x8x16xf32>
    %59 = arith.mulf %54, %58 : vector<4x8x16xf32>
    %c0_29 = arith.constant 0 : index
    %c0_30 = arith.constant 0 : index
    %c0_31 = arith.constant 0 : index
    %c0_32 = arith.constant 0 : index
    %60 = vector.load %arg20[%c0_29, %c0_30, %c0_31, %c0_32] : memref<1x4x8x16xf32, #tpu.memory_space<vmem>>, vector<1x4x8x16xf32>
    %61 = vector.shape_cast %60 : vector<1x4x8x16xf32> to vector<4x8x16xf32>
    %62 = vector.shape_cast %59 : vector<4x8x16xf32> to vector<1x4x8x16xf32>
    tpu.vector_store %arg20[%c0_29, %c0_30, %c0_31, %c0_32], %62 {strides = array<i32>} : memref<1x4x8x16xf32, #tpu.memory_space<vmem>>, vector<1x4x8x16xf32>,
    %63 = arith.truncf %59 : vector<4x8x16xf32> to vector<4x8x16xbf16>
    "tpu.trace_start"() <{level = 10 : i32, message = "htm,mhd->thd"}> : () -> ()
    %cst_33 = arith.constant dense<0.000000e+00> : vector<4x8x8xf32>
    %64 = tpu.matmul %40, %63, %cst_33 {dimension_numbers = #tpu.dot_dimension_numbers<[0], [2], [2], [1], [0, 1, 0, 2, 1, 1], [1], [0]>} : vector<16x4x8xbf16>, vector<4x8x16xbf16>, vector<4x8x8xf32> -> vector<4x8x8xf32>
    %65 = tpu.transpose %64, [2, 0, 1] : vector<4x8x8xf32> -> vector<8x4x8xf32>
    "tpu.trace_stop"() : () -> ()
    %66 = vector.shape_cast %65 : vector<8x4x8xf32> to vector<8x32xf32>
    %67 = arith.truncf %66 : vector<8x32xf32> to vector<8x32xbf16>
    %c0_34 = arith.constant 0 : index
    %c0_35 = arith.constant 0 : index
    %68 = vector.load %arg11[%c0_34, %c0_35] : memref<32x32xbf16, #tpu.memory_space<vmem>>, vector<32x32xbf16>
    %cst_36 = arith.constant dense<0.000000e+00> : vector<8x32xf32>
    %69 = tpu.matmul %67, %68, %cst_36 {dimension_numbers = #tpu.dot_dimension_numbers<[1], [0], [0], [1], [0, 0, 1, 1], [], []>} : vector<8x32xbf16>, vector<32x32xbf16>, vector<8x32xf32> -> vector<8x32xf32>
    %c0_37 = arith.constant 0 : index
    %c0_38 = arith.constant 0 : index
    %70 = vector.load %arg12[%c0_37, %c0_38] : memref<1x32xf32, #tpu.memory_space<vmem>>, vector<1x32xf32>
    %71 = vector.broadcast %70 : vector<1x32xf32> to vector<8x32xf32>
    %72 = arith.addf %69, %71 : vector<8x32xf32>
    %73 = arith.addf %1, %72 : vector<8x32xf32>
    %c0_39 = arith.constant 0 : index
    %c0_40 = arith.constant 0 : index
    %74 = vector.load %arg13[%c0_39, %c0_40] : memref<1x32xf32, #tpu.memory_space<vmem>>, vector<1x32xf32>
    %c0_41 = arith.constant 0 : index
    %c0_42 = arith.constant 0 : index
    %75 = vector.load %arg14[%c0_41, %c0_42] : memref<1x32xf32, #tpu.memory_space<vmem>>, vector<1x32xf32>
    %cst_43 = arith.constant dense<0.000000e+00> : vector<8xf32>
    %76 = vector.multi_reduction <add>, %73, %cst_43 [1] : vector<8x32xf32> to vector<8xf32>
    %77 = vector.shape_cast %76 : vector<8xf32> to vector<8x1xf32>
    %cst_44 = arith.constant 3.200000e+01 : f32
    %78 = vector.broadcast %cst_44 : f32 to vector<8x1xf32>
    %79 = arith.divf %77, %78 : vector<8x1xf32>
    %80 = vector.broadcast %79 : vector<8x1xf32> to vector<8x32xf32>
    %81 = arith.subf %73, %80 : vector<8x32xf32>
    %82 = arith.mulf %81, %81 : vector<8x32xf32>
    %cst_45 = arith.constant dense<0.000000e+00> : vector<8xf32>
    %83 = vector.multi_reduction <add>, %82, %cst_45 [1] : vector<8x32xf32> to vector<8xf32>
    %84 = vector.shape_cast %83 : vector<8xf32> to vector<8x1xf32>
    %cst_46 = arith.constant 3.200000e+01 : f32
    %85 = vector.broadcast %cst_46 : f32 to vector<8x1xf32>
    %86 = arith.divf %84, %85 : vector<8x1xf32>
    %cst_47 = arith.constant 9.99999974E-6 : f32
    %87 = vector.broadcast %cst_47 : f32 to vector<8x1xf32>
    %88 = arith.addf %86, %87 : vector<8x1xf32>
    %89 = math.rsqrt %88 : vector<8x1xf32>
    %90 = vector.broadcast %89 : vector<8x1xf32> to vector<8x32xf32>
    %91 = arith.mulf %81, %90 : vector<8x32xf32>
    %92 = vector.broadcast %74 : vector<1x32xf32> to vector<8x32xf32>
    %93 = arith.mulf %91, %92 : vector<8x32xf32>
    %94 = vector.broadcast %75 : vector<1x32xf32> to vector<8x32xf32>
    %95 = arith.addf %93, %94 : vector<8x32xf32>
    %96 = arith.truncf %95 : vector<8x32xf32> to vector<8x32xbf16>
    %c0_48 = arith.constant 0 : index
    %c0_49 = arith.constant 0 : index
    %97 = vector.load %arg15[%c0_48, %c0_49] : memref<32x64xbf16, #tpu.memory_space<vmem>>, vector<32x64xbf16>
    %cst_50 = arith.constant dense<0.000000e+00> : vector<8x64xf32>
    %98 = tpu.matmul %96, %97, %cst_50 {dimension_numbers = #tpu.dot_dimension_numbers<[1], [0], [0], [1], [0, 0, 1, 1], [], []>} : vector<8x32xbf16>, vector<32x64xbf16>, vector<8x64xf32> -> vector<8x64xf32>
    %c0_51 = arith.constant 0 : index
    %c0_52 = arith.constant 0 : index
    %99 = vector.load %arg16[%c0_51, %c0_52] : memref<1x64xf32, #tpu.memory_space<vmem>>, vector<1x64xf32>
    %100 = vector.broadcast %99 : vector<1x64xf32> to vector<8x64xf32>
    %101 = arith.addf %98, %100 : vector<8x64xf32>
    %cst_53 = arith.constant 0.000000e+00 : f32
    %102 = vector.broadcast %cst_53 : f32 to vector<8x64xf32>
    %103 = arith.maximumf %101, %102 : vector<8x64xf32>
    %104 = arith.truncf %103 : vector<8x64xf32> to vector<8x64xbf16>
    %c0_54 = arith.constant 0 : index
    %c0_55 = arith.constant 0 : index
    %105 = vector.load %arg17[%c0_54, %c0_55] : memref<64x32xbf16, #tpu.memory_space<vmem>>, vector<64x32xbf16>
    %cst_56 = arith.constant dense<0.000000e+00> : vector<8x32xf32>
    %106 = tpu.matmul %104, %105, %cst_56 {dimension_numbers = #tpu.dot_dimension_numbers<[1], [0], [0], [1], [0, 0, 1, 1], [], []>} : vector<8x64xbf16>, vector<64x32xbf16>, vector<8x32xf32> -> vector<8x32xf32>
    %c0_57 = arith.constant 0 : index
    %c0_58 = arith.constant 0 : index
    %107 = vector.load %arg18[%c0_57, %c0_58] : memref<1x32xf32, #tpu.memory_space<vmem>>, vector<1x32xf32>
    %108 = vector.broadcast %107 : vector<1x32xf32> to vector<8x32xf32>
    %109 = arith.addf %106, %108 : vector<8x32xf32>
    %110 = arith.addf %73, %109 : vector<8x32xf32>
    %c0_59 = arith.constant 0 : index
    %c0_60 = arith.constant 0 : index
    %c0_61 = arith.constant 0 : index
    %111 = vector.load %arg19[%c0_59, %c0_60, %c0_61] : memref<1x8x32xf32, #tpu.memory_space<vmem>>, vector<1x8x32xf32>
    %112 = vector.shape_cast %111 : vector<1x8x32xf32> to vector<8x32xf32>
    %113 = vector.shape_cast %110 : vector<8x32xf32> to vector<1x8x32xf32>
    tpu.vector_store %arg19[%c0_59, %c0_60, %c0_61], %113 {strides = array<i32>} : memref<1x8x32xf32, #tpu.memory_space<vmem>>, vector<1x8x32xf32>,
    return
  }
  func.func @transform_0(%arg0: i32, %arg1: i32) -> (i32, i32, i32) {
    %c0_i32 = arith.constant 0 : i32
    %c0_i32_0 = arith.constant 0 : i32
    return %arg0, %arg1, %c0_i32 : i32, i32, i32
  }
  func.func @transform_1(%arg0: i32, %arg1: i32) -> (i32, i32, i32) {
    %c0_i32 = arith.constant 0 : i32
    %c0_i32_0 = arith.constant 0 : i32
    %c0_i32_1 = arith.constant 0 : i32
    return %arg0, %c0_i32, %c0_i32_0 : i32, i32, i32
  }
  func.func @transform_2(%arg0: i32, %arg1: i32) -> (i32, i32, i32) {
    %c0_i32 = arith.constant 0 : i32
    %c0_i32_0 = arith.constant 0 : i32
    %c0_i32_1 = arith.constant 0 : i32
    return %arg0, %c0_i32, %c0_i32_0 : i32, i32, i32
  }
  func.func @transform_3(%arg0: i32, %arg1: i32) -> (i32, i32) {
    %c0_i32 = arith.constant 0 : i32
    %c0_i32_0 = arith.constant 0 : i32
    %c0_i32_1 = arith.constant 0 : i32
    return %c0_i32, %c0_i32_0 : i32, i32
  }
  func.func @transform_4(%arg0: i32, %arg1: i32) -> (i32, i32) {
    %c0_i32 = arith.constant 0 : i32
    %c0_i32_0 = arith.constant 0 : i32
    %c0_i32_1 = arith.constant 0 : i32
    return %c0_i32, %c0_i32_0 : i32, i32
  }
  func.func @transform_5(%arg0: i32, %arg1: i32) -> (i32, i32) {
    %c0_i32 = arith.constant 0 : i32
    %c0_i32_0 = arith.constant 0 : i32
    %c0_i32_1 = arith.constant 0 : i32
    return %c0_i32, %c0_i32_0 : i32, i32
  }
  func.func @transform_6(%arg0: i32, %arg1: i32) -> (i32, i32) {
    %c0_i32 = arith.constant 0 : i32
    %c0_i32_0 = arith.constant 0 : i32
    %c0_i32_1 = arith.constant 0 : i32
    return %c0_i32, %c0_i32_0 : i32, i32
  }
  func.func @transform_7(%arg0: i32, %arg1: i32) -> (i32, i32) {
    %c0_i32 = arith.constant 0 : i32
    %c0_i32_0 = arith.constant 0 : i32
    %c0_i32_1 = arith.constant 0 : i32
    return %c0_i32, %c0_i32_0 : i32, i32
  }
  func.func @transform_8(%arg0: i32, %arg1: i32) -> (i32, i32) {
    %c0_i32 = arith.constant 0 : i32
    %c0_i32_0 = arith.constant 0 : i32
    %c0_i32_1 = arith.constant 0 : i32
    return %c0_i32, %c0_i32_0 : i32, i32
  }
  func.func @transform_9(%arg0: i32, %arg1: i32) -> (i32, i32) {
    %c0_i32 = arith.constant 0 : i32
    %c0_i32_0 = arith.constant 0 : i32
    %c0_i32_1 = arith.constant 0 : i32
    return %c0_i32, %c0_i32_0 : i32, i32
  }
  func.func @transform_10(%arg0: i32, %arg1: i32) -> (i32, i32) {
    %c0_i32 = arith.constant 0 : i32
    %c0_i32_0 = arith.constant 0 : i32
    %c0_i32_1 = arith.constant 0 : i32
    return %c0_i32, %c0_i32_0 : i32, i32
  }
  func.func @transform_11(%arg0: i32, %arg1: i32) -> (i32, i32) {
    %c0_i32 = arith.constant 0 : i32
    %c0_i32_0 = arith.constant 0 : i32
    %c0_i32_1 = arith.constant 0 : i32
    return %c0_i32, %c0_i32_0 : i32, i32
  }
  func.func @transform_12(%arg0: i32, %arg1: i32) -> (i32, i32) {
    %c0_i32 = arith.constant 0 : i32
    %c0_i32_0 = arith.constant 0 : i32
    %c0_i32_1 = arith.constant 0 : i32
    return %c0_i32, %c0_i32_0 : i32, i32
  }
  func.func @transform_13(%arg0: i32, %arg1: i32) -> (i32, i32) {
    %c0_i32 = arith.constant 0 : i32
    %c0_i32_0 = arith.constant 0 : i32
    %c0_i32_1 = arith.constant 0 : i32
    return %c0_i32, %c0_i32_0 : i32, i32
  }
  func.func @transform_14(%arg0: i32, %arg1: i32) -> (i32, i32) {
    %c0_i32 = arith.constant 0 : i32
    %c0_i32_0 = arith.constant 0 : i32
    %c0_i32_1 = arith.constant 0 : i32
    return %c0_i32, %c0_i32_0 : i32, i32
  }
  func.func @transform_15(%arg0: i32, %arg1: i32) -> (i32, i32) {
    %c0_i32 = arith.constant 0 : i32
    %c0_i32_0 = arith.constant 0 : i32
    %c0_i32_1 = arith.constant 0 : i32
    return %c0_i32, %c0_i32_0 : i32, i32
  }
  func.func @transform_16(%arg0: i32, %arg1: i32) -> (i32, i32) {
    %c0_i32 = arith.constant 0 : i32
    %c0_i32_0 = arith.constant 0 : i32
    %c0_i32_1 = arith.constant 0 : i32
    return %c0_i32, %c0_i32_0 : i32, i32
  }
  func.func @transform_17(%arg0: i32, %arg1: i32) -> (i32, i32, i32) {
    %c0_i32 = arith.constant 0 : i32
    %c0_i32_0 = arith.constant 0 : i32
    return %arg0, %arg1, %c0_i32 : i32, i32, i32
  }
  func.func @transform_18(%arg0: i32, %arg1: i32) -> (i32, i32, i32, i32) {
    %c0_i32 = arith.constant 0 : i32
    %c0_i32_0 = arith.constant 0 : i32
    %c0_i32_1 = arith.constant 0 : i32
    return %arg0, %c0_i32, %arg1, %c0_i32_0 : i32, i32, i32, i32
  }
}

</mosaic_0001>

<bundles_post_ra>
// kernel: tpu_custom_call.1
= control target key start
LH: loop header
LB: loop body
LE: loop exit
PB: predicated region body
PF: predicated region fallthrough
CT: control target
= control target key end

     0   :  { %s3277_s0 = inlined_call_operand.vmem [shape: f32[2,16,32], index: 0, kind: input, shape index: {}]   ;;  %s3278_s1 = inlined_call_operand.hbm [shape: f32[2,16,32], index: 1, kind: input, shape index: {}]   ;;  %s3279_s2 = inlined_call_operand.hbm [shape: f32[2,1,16], index: 2, kind: input, shape index: {}]   ;;  %s3280_s3 = inlined_call_operand.vmem [shape: f32[1,32], index: 3, kind: input, shape index: {}]   ;;  %s3281_s4 = inlined_call_operand.vmem [shape: f32[1,32], index: 4, kind: input, shape index: {}]   ;;  %s3282_s5 = inlined_call_operand.vmem [shape: bf16[32,32], index: 5, kind: input, shape index: {}]   ;;  %s3283_s6 = inlined_call_operand.vmem [shape: f32[1,32], index: 6, kind: input, shape index: {}]   ;;  %s3284_s7 = inlined_call_operand.hbm [shape: bf16[32,64], index: 7, kind: input, shape index: {}]   ;;  %s3285_s8 = inlined_call_operand.vmem [shape: f32[1,64], index: 8, kind: input, shape index: {}]   ;;  %s3286_s9 = inlined_call_operand.hbm [shape: bf16[32,32], index: 9, kind: input, shape index: {}]   ;;  %s3287_s10 = inlined_call_operand.vmem [shape: f32[1,32], index: 10, kind: input, shape index: {}]   ;;  %s3288_s11 = inlined_call_operand.vmem [shape: f32[1,32], index: 11, kind: input, shape index: {}]   ;;  %s3289_s12 = inlined_call_operand.vmem [shape: f32[1,32], index: 12, kind: input, shape index: {}]   ;;  %s3290_s13 = inlined_call_operand.hbm [shape: bf16[32,64], index: 13, kind: input, shape index: {}]   ;;  %s3291_s14 = inlined_call_operand.vmem [shape: f32[1,64], index: 14, kind: input, shape index: {}]   ;;  %s3292_s15 = inlined_call_operand.vmem [shape: bf16[64,32], index: 15, kind: input, shape index: {}]   ;;  %s3293_s16 = inlined_call_operand.vmem [shape: f32[1,32], index: 16, kind: input, shape index: {}]   ;;  %s3294_s17 = inlined_call_operand.hbm [shape: f32[2,16,32], index: 17, kind: output, shape index: {0}]   ;;  %s3295_s18 = inlined_call_operand.hbm [shape: f32[2,4,16,16], index: 18, kind: output, shape index: {1}]  }
   0x1   :  { %3309 = sst [smem:[#allocation31_spill]] %s3277_s0 }
   0x2   :  { %3310 = sst [smem:[#allocation32_spill]] %s3278_s1 }
   0x3   :  { %3311 = sst [smem:[#allocation33_spill]] %s3279_s2 }
   0x4   :  { %3312 = sst [smem:[#allocation34_spill]] %s3280_s3 }
   0x5   :  { %3313 = sst [smem:[#allocation35_spill]] %s3281_s4 }
   0x6   :  { %3314 = sst [smem:[#allocation36_spill]] %s3282_s5 }
   0x7   :  { %3315 = sst [smem:[#allocation37_spill]] %s3283_s6 }
   0x8   :  { %3316 = sst [smem:[#allocation38_spill]] %s3284_s7 }
   0x9   :  { %3317 = sst [smem:[#allocation39_spill]] %s3286_s9 }
   0xa   :  { %3318 = sst [smem:[#allocation40_spill]] %s3287_s10 }
   0xb   :  { %3319 = sst [smem:[#allocation41_spill]] %s3288_s11 }
   0xc   :  { %3320 = sst [smem:[#allocation42_spill]] %s3289_s12 }
   0xd   :  { %3321 = sst [smem:[#allocation43_spill]] %s3290_s13 }
   0xe   :  { %3322 = sst [smem:[#allocation44_spill]] %s3291_s14 }
   0xf   :  { %3323 = sst [smem:[#allocation45_spill]] %s3292_s15 }
  0x10   :  { %3324 = sst [smem:[#allocation46_spill]] %s3293_s16 }
  0x11   :  { %3325 = sst [smem:[#allocation47_spill]] %s3294_s17 }
  0x12   :  { %3326 = sst [smem:[#allocation48_spill]] %s3295_s18 }
  0x13   :  { %24 = vsyncpa [#allocation5], 0 }
  0x14   :  { %26 = vsyncpa [#allocation5 + $0x1], 0 }
  0x15   :  { %27 = vsyncpa [#allocation8], 0 }
  0x16   :  { %29 = vsyncpa [#allocation8 + $0x1], 0 }
  0x17   :  { %30 = vsyncpa [#allocation11], 0 }
  0x18   :  { %31 = vsyncpa [#allocation6], 0 }
  0x19   :  { %33 = vsyncpa [#allocation6 + $0x1], 0 }
  0x1a   :  { %34 = vsyncpa [#allocation15], 0 }
  0x1b   :  { %36 = vsyncpa [#allocation15 + $0x1], 0  ;;  %s2813_s27 = smov 0   ;;  %s2815_s28 = smov 0  }
  0x1c   :  { %s2817_s29 = smov 0   ;;  %s2819_s30 = smov 0  }
  0x1d   :  { %s2821_s0 = smov 0   ;;  %s2823_s19 = smov 0  }
  0x1e   :  { %s2825_s1 = smov 0   ;;  %s2827_s20 = smov 0  }
  0x1f   :  { %s2829_s21 = smov 0   ;;  %s2831_s22 = smov 0  }
  0x20   :  { %s2833_s2 = smov 0  }
  0x21 LB: > { %3327 = sst [smem:[#allocation22_spill]] %s2656_s27  ;;  %s2867_s23 = sadd.s32 4294967295, %s2696_s2   ;;  %s2696_s2 = sphi %s2833_s2, %s42_s2   ;;  %s2692_s22 = sphi %s2831_s22, %s3377_s22   ;;  %s2688_s21 = sphi %s2829_s21, %s3368_s21   ;;  %s2684_s20 = sphi %s2827_s20, %s3376_s20   ;;  %s2680_s1 = sphi %s2825_s1, %s3367_s1   ;;  %s2676_s19 = sphi %s2823_s19, %s3375_s19   ;;  %s2672_s0 = sphi %s2821_s0, %s3374_s0   ;;  %s2668_s30 = sphi %s2819_s30, %s3373_s30   ;;  %s2664_s29 = sphi %s2817_s29, %s3372_s29   ;;  %s2660_s28 = sphi %s2815_s28, %s3371_s28   ;;  %s2656_s27 = sphi %s2813_s27, %s3370_s27  }
  0x22   : > { %3328 = sst [smem:[#allocation23_spill]] %s2676_s19  ;;  %s2053_s24 = sadd.s32 4294967294, %s2696_s2  }
  0x23   : > { %3329 = sst [smem:[#allocation24_spill]] %s2688_s21  ;;  %p102_p0 = scmp.ne.s32.totalorder %s2672_s0, %s2668_s30 }
  0x24   : > { %p103_p1 = scmp.eq.s32.totalorder %s2867_s23, 0  ;;  %p447_p2 = scmp.ne.s32.totalorder %s2664_s29, %s2660_s28 }
  0x25   : > { %p448_p4 = scmp.eq.s32.totalorder %s2867_s23, 3  ;;  %p453_p5 = scmp.ne.s32.totalorder %s2660_s28, %s2656_s27 }
  0x26   : > { %p2877_p3 = por %p103_p1, %p102_p0  ;;  %p454_p6 = scmp.eq.s32.totalorder %s2053_s24, 3 }
  0x27   : > { %p2884_p7 = por %p448_p4, %p447_p2  ;;  %p2054_p8 = scmp.ge.s32.totalorder %s2696_s2, 1 }
  0x28   : > { %p2889_p9 = por %p454_p6, %p453_p5  ;;  %p489_p10 = scmp.lt.s32.totalorder %s2696_s2, 5 }
  0x29   : > { %s3331_s17 = scalar_select %p2884_p7, 1, 0 }
  0x2a   : > { %s3333_s16 = scalar_select %p2889_p9, 1, 0 }
  0x2b   : > { %3332 = sst [smem:[#allocation25_spill]] %s3331_s17  ;;  %p2897_p11 = pnand %p2054_p8, %p489_p10 }
  0x2c   : > { %3334 = sst [smem:[#allocation26_spill]] %s3333_s16  ;;  %s2698_s24 = smov [#allocation9]  }
  0x2d   : > { %s3335_s7 = sld [smem:[#allocation38_spill]]  ;;  %p2184_p12 = pneg %p2897_p11 }
  0x2e   : > { %s514_s27 = sshll.u32 %s2698_s24, 4  ;;  %s3338_s9 = sld [smem:[#allocation39_spill]]  ;;  %s515_s27 = int_to_ptr.vmem [resolvable:$true] %s514_s27 }
  0x2f   : > { %p2905_p13 = pnand %p2184_p12, %p103_p1  ;;  %s2699_s30 = smov 64  }
  0x30   : > { %s2701_s24 = smov [#allocation10]   ;;  %s3339_s13 = sld [smem:[#allocation43_spill]] }
  0x31   : > { %s531_s11 = sshll.u32 %s2701_s24, 4  ;;  %s2702_s16 = smov [#allocation12]   ;;  %s532_s11 = int_to_ptr.vmem [resolvable:$true] %s531_s11 }
  0x32   : > { %s89_s24 = sadd.s32 1, %s2676_s19  ;;  %p96_p2 = scmp.ne.s32.totalorder %s2676_s19, %s2672_s0 }
  0x33   : > { %s512_s18 = sshll.u32 %s3335_s7, 4  ;;  %s2700_s7 = smov 4   ;;  %s513_s18 = int_to_ptr.hbm [resolvable:$true] %s512_s18 }
  0x34   : > { %s529_s25 = sshll.u32 %s3338_s9, 4  ;;  %s554_s9 = sshll.u32 %s2702_s16, 4  ;;  %s530_s25 = int_to_ptr.hbm [resolvable:$true] %s529_s25  ;;  %s555_s9 = int_to_ptr.vmem [resolvable:$true] %s554_s9 }
  0x35   : > { %2187 = dma.hbm_to_vmem [thread:$0]  (!%p2905_p13), %s513_s18, 256, %s515_s27, [#allocation8], %s2699_s30, %s2699_s30, %s2700_s7  }
  0x36   : > { %s552_s12 = sshll.u32 %s3339_s13, 4  ;;  %s51_s18 = sadd.s32 1, %s2688_s21  ;;  %s553_s12 = int_to_ptr.hbm [resolvable:$true] %s552_s12 }
  0x37   : > { %2190 = dma.hbm_to_vmem [thread:$0]  (!%p2905_p13), %s530_s25, 256, %s532_s11, [#allocation11], %s2699_s30, %s2699_s30, %s2700_s7  }
  0x38   : > { %2193 = dma.hbm_to_vmem [thread:$0]  (!%p2905_p13), %s553_s12, 256, %s555_s9, [#allocation11], %s2699_s30, %s2699_s30, %s2700_s7  }
  0x39   : > { %p52_p0 = scmp.ge.s32.totalorder %s51_s18, 2  ;;  %s54_s27 = sadd.s32 1, %s2692_s22 }
  0x3a   : > { %p97_p4 = scmp.eq.s32.totalorder %s2696_s2, 0  ;;  %p2211_p6 = scmp.lt.s32.totalorder %s2696_s2, 4 }
  0x3b   : > { %s3379_s18 = smov (%p52_p0, %s51_s18), 0  ;;  %s3381_s27 = smov (!%p52_p0, %s54_s27), %s2692_s22 }
  0x3c   : > { %3340 = sst [smem:[#allocation27_spill]] %s3379_s18  ;;  %s433_s10 = ssub.s32 %s2688_s21, %s3379_s18 }
  0x3d   : > { %p56_p5 = scmp.ge.s32.totalorder %s3381_s27, 2  ;;  %p2933_p8 = por %p97_p4, %p96_p2 }
  0x3e   : > { %s588_s9 = sand.u32 1, %s2676_s19   ;;  %s2149_s25 = sshll.u32 %s2692_s22, 4 }
  0x3f   : > { %s3383_s27 = smov (%p56_p5, %s3381_s27), 0  ;;  %s2059_s11 = sshll.u32 %s588_s9, 4 }
  0x40   : > { %3342 = sst [smem:[#allocation28_spill]] %s3383_s27  ;;  %s86_s15 = ssub.s32 %s2692_s22, %s3383_s27 }
  0x41   : > { %p87_p10 = scmp.eq.s32.totalorder %s86_s15, 0  ;;  %s434_s17 = sor.u32 %s433_s10, %s86_s15 }
  0x42   : > { %p435_p12 = scmp.eq.s32.totalorder %s434_s17, 0  ;;  %s3344_s12 = sadd.s32 1, %s2664_s29 }
  0x43   : > { %s2944_s30 = scalar_select %p87_p10, %s2676_s19, %s89_s24  }
  0x44   : > { %s2949_s16 = scalar_select %p435_p12, %s2664_s29, %s3344_s12  }
  0x45   : > { %3343 = sst [smem:[#allocation29_spill]] %s2944_s30  ;;  %s592_s4 = scalar_lea.vmem [#allocation4], %s2059_s11 }
  0x46   : > { %3345 = sst [smem:[#allocation30_spill]] %s2949_s16  ;;  %s600_s3 = sshll.u32 %s592_s4, 4  ;;  %s601_s3 = int_to_ptr.vmem [resolvable:$true] %s600_s3 }
  0x47   : > { %s3346_s21 = sld [smem:[#allocation32_spill]]  ;;  %p2195_p13 = pnand %p2211_p6, %p2933_p8 }
  0x48   : > { %s610_s10 = sand.u32 1, %s2696_s2   ;;  %s589_s15 = scalar_lea.sflag [#allocation5], %s588_s9 }
  0x49   : > { %s2703_s17 = smov 128   ;;  %s2704_s24 = smov 8  }
  0x4a   : > { %s3347_s30 = sld [smem:[#allocation33_spill]]  ;;  %s613_s16 = scalar_lea.vmem [#allocation7], %s588_s9 }
  0x4b   : > { %s620_s13 = sshll.u32 %s613_s16, 4  ;;  %s611_s4 = scalar_lea.sflag [#allocation8], %s610_s10  ;;  %s621_s13 = int_to_ptr.vmem [resolvable:$true] %s620_s13 }
  0x4d   : > { %s597_s6 = scalar_lea.hbm %s3346_s21, %s2149_s25 }
  0x4e   : > { %s598_s5 = sshll.u32 %s597_s6, 4  ;;  %629 = sbr.rel (%p2897_p11) target bundleno = 2633 (0xa49), region = 88  ;;  %s599_s5 = int_to_ptr.hbm [resolvable:$true] %s598_s5 }
  0x4f   : > { %2197 = dma.hbm_to_vmem [thread:$0]  (!%p2195_p13), %s599_s5, 256, %s601_s3, %s589_s15, %s2703_s17, %s2703_s17, %s2704_s24  }
  0x50   : > { %s616_s19 = scalar_lea.hbm %s3347_s30, %s2692_s22  ;;  %s631_s6 = sand.u32 (!%p2897_p11), 1, %s2672_s0  }
  0x51   : > { %s618_s21 = sshll.u32 %s616_s19, 4  ;;  %s2063_s18 = sshll.u32 (!%p2897_p11), %s631_s6, 4  ;;  %s619_s21 = int_to_ptr.hbm [resolvable:$true] %s618_s21 }
  0x52   : > { %2200 = dma.hbm_to_vmem [thread:$0]  (!%p2195_p13), %s619_s21, 16, %s621_s13, %s611_s4  }
  0x53   : > { %s632_s7 = scalar_lea.sflag [#allocation5], %s631_s6  ;;  %s2966_s3 = scalar_lea.vmem [#allocation4], %s2063_s18 }
  0x54   : > { %2631 = dma.done.wait (%p2877_p3), %s632_s7, 256  }
  0x55   : > { %2633 = vsyncadd (%p2877_p3), %s632_s7, 4294967040  ;;  %s641_s5 = sand.u32 1, %s2867_s23   ;;  %s644_s27 = scalar_lea.vmem [#allocation7], %s631_s6 }
  0x56   : > { %s642_s19 = scalar_lea.sflag [#allocation8], %s641_s5 }
  0x57   : > { %2635 = dma.done.wait (%p2877_p3), %s642_s19, 16  }
  0x58   : > { %2637 = vsyncadd (%p2877_p3), %s642_s19, 4294967280 }
  0x59   : > { %2639 = dma.done.wait (%p103_p1), [#allocation8], 256  }
  0x5a   : > { %2641 = vsyncadd (%p103_p1), [#allocation8], 4294967040 }
  0x5b   : > { %2643 = dma.done.wait (%p103_p1), [#allocation11], 512  }
  0x5c   : > { %2645 = vsyncadd (%p103_p1), [#allocation11], 4294966784  ;;  %p730_p11 = scmp.lt.s32.totalorder %s2684_s20, 1  ;;  %p732_p0 = scmp.lt.s32.totalorder %s2680_s1, 1  ;;  %v2997_v0 = vld [vmem:[%s644_s27] sm:$0x1] }
  0x5d   : > { %s2988_s14 = sand.u32 1, %s2660_s28   ;;  %s3348_s17 = sld [smem:[#allocation31_spill]] }
  0x5e   : > { %s731_s26 = scalar_select %p730_p11, %s2684_s20, 1 }
  0x5f   : > { %s733_s9 = scalar_select %p732_p0, %s2680_s1, 1 }
  0x60   : > { %s2069_s11 = sshll.u32 %s731_s26, 1  ;;  %s2067_s25 = sshll.u32 %s2988_s14, 3 }
  0x61   : > { %s735_s30 = sadd.s32 %s2069_s11, %s733_s9  ;;  %s2068_s10 = sshll.u32 %s2988_s14, 5 }
  0x62   : > { %s2070_s16 = sshll.u32 %s735_s30, 3  ;;  %s3001_s12 = scalar_lea.vmem [#allocation13], %s2067_s25 }
  0x63   : > { %s737_s24 = scalar_lea.vmem %s3348_s17, %s2070_s16  ;;  %s3003_s13 = scalar_lea.vmem [#allocation14], %s2068_s10 }
  0x64   : > { %v2999_v1 = vld [vmem:[%s737_s24] sm:$0xff]  ;;  %p2071_p1 = scmp.ne.s32.totalorder %s2680_s1, 0 }
  0x65   : > { %s2705_s6 = smov (!%p2071_p1), 96  }
  0x66   : > { %744 = sbr.rel (%p2071_p1) target bundleno = 369 (0x171), region = 112 }
  0x6b   : > { %v2151_v2 = vld [vmem:[#allocation9 + $0x8] sm:$0xff]  ;;  %v2150_v3 = vld [vmem:[#allocation9] sm:$0xff]  ;;  %vm768_vm0 = vcmask 261120   ;;  %vm788_vm1 = vcmask 257024  }
  0x6c   : > { %778 = vmatpush.bf16.msra.mxu0 %v2151_v2  ;;  %v745_v4 = vld [vmem:[%s2966_s3] sm:$0xff]  ;;  %v746_v5 = vld [vmem:[%s2966_s3 + $0x8] sm:$0xff] }
  0x6d   : > { %v747_v6 = vpack.c.bf16 %v746_v5, %v745_v4  ;;  %v2326_v7 = vld [vmem:[%s3285_s8] ss:$0 sm:$0xff] }
  0x70   : > { %779 = vmatpush.bf16.msra.mxu0 %v2150_v3 }
  0x73   : > { %2080 = vmatmul.msk.bf16.vlgmr.msra.gmra.mxu0 %vm768_vm0, %v747_v6 }
  0xf0   : > { %v781_v8 = vpop.f32.mrf.mxu0 }
  0xf1   : > { %v782_v9 = vadd.f32 %v2326_v7, %v781_v8 }
  0xf3   : > { %v786_v10 = vpack.c.bf16 %v782_v9, %v782_v9 }
  0xf5   : > { %789 = vst.msk [vmem:[#allocation2] sm:$0xf] %vm788_vm1, %v786_v10  ;;  %793 = vrot.lane.b32.xlu0 %v786_v10, %s2705_s6 }
  0xf8   : > { %v783_v11 = vpop.f32.mrf.mxu0 }
  0xf9   : > { %v784_v12 = vadd.f32 %v2326_v7, %v783_v11 }
  0xfb   : > { %v787_v13 = vpack.c.bf16 %v784_v12, %v784_v12 }
  0xfd   : > { %790 = vst.msk [vmem:[#allocation2 + $0x4] sm:$0xf] %vm788_vm1, %v787_v13  ;;  %795 = vrot.lane.b32.xlu0 %v787_v13, %s2705_s6 }
 0x167   : > { %v794_v14 = vpop.permute.xlu0 %793 }
 0x168   : > { %799 = vst.msk [vmem:[#allocation3] sm:$0xf] %vm788_vm1, %v794_v14 }
 0x16f   : > { %v796_v15 = vpop.permute.xlu0 %795 }
 0x170   : > { %800 = vst.msk [vmem:[#allocation3 + $0x4] sm:$0xf] %vm788_vm1, %v796_v15 }
 0x171 PF: > { %vm803_vm2 = vcmask 261120   ;;  %v2706_v17 = vmov 32.0   ;;  %s3349_s3 = sld [smem:[#allocation36_spill]]  ;;  %v953_v31 = vld [vmem:[#allocation2] sm:$0xf]  ;;  %s2707_s27 = smov 112  }
 0x172   : > { %v804_v16 = vsel %vm803_vm2, %v2999_v1, 0.0  ;;  %2358 = vrcp.f32 %v2706_v17  ;;  %v954_v32 = vld [vmem:[#allocation2 + $0x4] sm:$0xf]  ;;  %961 = vrot.lane.b32.xlu1 %v953_v31, %s2707_s27  ;;  %s2708_s26 = smov 120   ;;  %s2709_s9 = smov 104   ;;  %vm889_vm7 = vcmask 1047556  }
 0x173   : > { %805 = vadd.xlane.f32.xlu0 %v804_v16  ;;  %957 = vrot.lane.b32.xlu2 %v953_v31, %s2708_s26  ;;  %s3350_s30 = sld [smem:[#allocation34_spill]]  ;;  %v2154_v63 = vld [vmem:[#allocation2] sm:$0xff]  ;;  %v2710_v8 = vmov 1983009808   ;;  %v2711_v16 = vmov 1934713408  }
 0x174   : > { %s3351_s23 = sld [smem:[#allocation35_spill]]  ;;  %v894_v9 = vunpack.c.l.s4 %v2710_v8  ;;  %v918_v17 = vunpack.c.l.s4 %v2711_v16  ;;  %vm1127_vm8 = vcmask 1043456   ;;  %vm1123_vm9 = vcmask 64512   ;;  %s2713_s21 = smov 24  }
 0x175   : > { %s3352_s24 = sld [smem:[#allocation37_spill]]  ;;  %vm985_vm10 = vcmp.gt.f32.partialorder %v2997_v0, 0.5  ;;  %vm1201_vm11 = vcmask 130048   ;;  %s2714_s4 = smov 16   ;;  %vm1662_vm12 = vcmask 195584   ;;  %vm1809_vm0 = vcmask 523264  }
 0x176   : > { %v3045_v14 = vunpack.c.0.s8 %v894_v9  ;;  %s2715_s6 = smov 8   ;;  %s3353_s5 = sld [smem:[#allocation40_spill]] }
 0x177   : > { %v2153_v29 = vld [vmem:[%s3349_s3 + $0x8] sm:$0xff]  ;;  %v2152_v30 = vld [vmem:[%s3349_s3] sm:$0xff]  ;;  %s3355_s16 = sld [smem:[#allocation41_spill]]  ;;  %s1834_s17 = scalar_lea.sflag [#allocation15], %s2988_s14 }
 0x178   : > { %v2359_v18 = vpop.eup %2358  ;;  %871 = vmatpush.bf16.msra.mxu0 %v2153_v29  ;;  %s3356_s15 = sld [smem:[#allocation42_spill]] }
 0x179   : > { %v808_v19 = vmul.f32 32.0, %v2359_v18  ;;  %vm812_vm3 = vweird.f32 %v2359_v18  ;;  %v2350_v42 = vld [vmem:[%s3350_s30] ss:$0 sm:$0xff] }
 0x17a   : > { %965 = vrot.lane.b32.xlu1 %v953_v31, %s2709_s9  ;;  %v2351_v45 = vld [vmem:[%s3351_s23] ss:$0 sm:$0xff]  ;;  %s1863_s23 = sshll.u32 %s3003_s13, 4  ;;  %s1864_s23 = int_to_ptr.vmem [resolvable:$true] %s1863_s23 }
 0x17b   : > { %v809_v20 = vsub.f32 1.0, %v808_v19  ;;  %963 = vrot.lane.b32.xlu2 %v954_v32, %s2707_s27  ;;  %v2352_v49 = vld [vmem:[%s3352_s24] ss:$0 sm:$0xff] }
 0x17c   : > { %872 = vmatpush.bf16.msra.mxu0 %v2152_v30 }
 0x17d   : > { %v810_v21 = vmul.f32 %v2359_v18, %v809_v20 }
 0x17f   : > { %v811_v22 = vadd.f32 %v2359_v18, %v810_v21 }
 0x181   : > { %v3013_v23 = vsel %vm812_vm3, %v2359_v18, %v811_v22  ;;  %v3050_v22 = vunpack.c.0.s8 %v918_v17 }
 0x1cd   : > { %v958_v53 = vpop.permute.xlu2 %957 }
 0x1ce   : > { %v1045_v60 = vunpack.c.l.b16 %v958_v53 }
 0x1d5   : > { %v964_v55 = vpop.permute.xlu2 %963 }
 0x1d6   : > { %v1048_v57 = vunpack.c.l.b16 %v964_v55 }
 0x1e4   : > { %v962_v54 = vpop.permute.xlu1 %961 }
 0x1e5   : > { %v1047_v56 = vunpack.c.l.b16 %v962_v54 }
 0x1e6   : > { %v806_v24 = vpop.xlane.xlu0 %805 }
 0x1e7   : > { %v814_v25 = vmul.f32 %v3013_v23, %v806_v24  ;;  %v1053_v58 = vpack.c.b16 %v1048_v57, %v1047_v56 }
 0x1e9   : > { %v815_v26 = vsub.f32 %v2999_v1, %v814_v25 }
 0x1eb   : > { %v816_v27 = vmul.f32 %v815_v26, %v815_v26 }
 0x1ec   : > { %v966_v3 = vpop.permute.xlu1 %965 }
 0x1ed   : > { %v817_v28 = vsel %vm803_vm2, %v816_v27, 0.0  ;;  %v1049_v4 = vunpack.c.l.b16 %v966_v3 }
 0x1ee   : > { %818 = vadd.xlane.f32.xlu0 %v817_v28 }
 0x202   : > { %959 = vrot.lane.b32.xlu0 %v954_v32, %s2708_s26 }
 0x261   : > { %v819_v33 = vpop.xlane.xlu0 %818 }
 0x262   : > { %v820_v34 = vmul.f32 %v819_v33, %v3013_v23 }
 0x264   : > { %v821_v35 = vadd.f32 1e-05, %v820_v34 }
 0x266   : > { %2360 = vrsqrt.f32 %v821_v35  ;;  %vm828_vm5 = vweird.f32 %v821_v35 }
 0x26c   : > { %v2361_v36 = vpop.eup %2360 }
 0x26d   : > { %v823_v37 = vmul.f32 %v2361_v36, %v821_v35  ;;  %vm829_vm4 = vweird.f32 %v2361_v36 }
 0x26e   : > { %vm830_vm6 = vmor %vm828_vm5, %vm829_vm4 }
 0x26f   : > { %v824_v38 = vmul.f32 %v2361_v36, %v823_v37 }
 0x271   : > { %v825_v39 = vmul.f32 0.5, %v824_v38 }
 0x273   : > { %v826_v40 = vsub.f32 1.5, %v825_v39 }
 0x274   : > { %v960_v59 = vpop.permute.xlu0 %959 }
 0x275   : > { %v827_v41 = vmul.f32 %v2361_v36, %v826_v40  ;;  %v1046_v61 = vunpack.c.l.b16 %v960_v59 }
 0x277   : > { %v831_v43 = vsel %vm830_vm6, %v2361_v36, %v827_v41  ;;  %v1052_v62 = vpack.c.b16 %v1046_v61, %v1045_v60 }
 0x278   : > { %v832_v44 = vmul.f32 %v831_v43, %v815_v26 }
 0x27a   : > { %v836_v46 = vmul.f32 %v2350_v42, %v832_v44 }
 0x27c   : > { %v840_v47 = vadd.f32 %v2351_v45, %v836_v46 }
 0x27e   : > { %v841_v48 = vpack.c.bf16 %v840_v47, %v840_v47 }
 0x280   : > { %2089 = vmatmul.msk.bf16.vlgmr.msra.gmra.mxu0 %vm803_vm2, %v841_v48 }
 0x2fd   : > { %v874_v50 = vpop.f32.mrf.mxu0 }
 0x2fe   : > { %v875_v51 = vadd.f32 %v2352_v49, %v874_v50 }
 0x300   : > { %885 = vrot.lane.b32.xlu2 %v875_v51, %s2709_s9  ;;  %879 = vrot.lane.b32.xlu1 %v875_v51, %s2708_s26  ;;  %v891_v19 = vrot.slane %v875_v51, 4 }
 0x305   : > { %v876_v52 = vpop.f32.mrf.mxu0 }
 0x308   : > { %967 = vrot.lane.b32.xlu2 %v954_v32, %s2709_s9  ;;  %882 = vrot.lane.b32.xlu1 %v875_v51, %s2707_s27 }
 0x32e   : > { %1091 = vxpose.xlu2.c.b16.start.end [1/1] (short) (narrow) %v1053_v58, 16 }
 0x33d   : > { %2327 = vxpose.binary.xlu1.c.b16.start.end [1/2] (short) (narrow) %v1052_v62, %v2154_v63, 16 }
 0x35a   : > { %v886_v2 = vpop.permute.xlu2 %885 }
 0x35b   : > { %v901_v12 = vrot.slane %v886_v2, 4 }
 0x362   : > { %v968_v5 = vpop.permute.xlu2 %967 }
 0x363   : > { %v1050_v6 = vunpack.c.l.b16 %v968_v5 }
 0x365   : > { %v1054_v7 = vpack.c.b16 %v1050_v6, %v1049_v4 }
 0x367   : > { %1107 = vxpose.xlu0.c.b16.start.end [1/1] (short) (narrow) %v1054_v7, 16 }
 0x372   : > { %v880_v10 = vpop.permute.xlu1 %879 }
 0x373   : > { %v903_v11 = vrot.slane %v880_v10, 4  ;;  %v902_v15 = vsel %vm889_vm7, %v901_v12, %v880_v10 }
 0x374   : > { %v908_v20 = vperm.slane %v902_v15, %v3045_v14 }
 0x375   : > { %v904_v13 = vsel %vm889_vm7, %v886_v2, %v903_v11 }
 0x376   : > { %v912_v18 = vperm.slane %v904_v13, %v3045_v14  ;;  %v913_v29 = vrot.slane %v908_v20, 4 }
 0x378   : > { %v925_v26 = vrot.slane %v912_v18, 4 }
 0x37a   : > { %v883_v21 = vpop.permute.xlu1 %882 }
 0x37b   : > { %v888_v24 = vrot.slane %v883_v21, 4  ;;  %v892_v25 = vsel %vm889_vm7, %v883_v21, %v891_v19 }
 0x37c   : > { %v900_v27 = vperm.slane %v892_v25, %v3045_v14 }
 0x37d   : > { %v890_v28 = vsel %vm889_vm7, %v888_v24, %v875_v51 }
 0x37e   : > { %v896_v30 = vperm.slane %v890_v28, %v3045_v14  ;;  %v926_v31 = vsel %vm889_vm7, %v925_v26, %v900_v27  ;;  %v927_v32 = vrot.slane %v900_v27, 4 }
 0x37f   : > { %v932_v33 = vperm.slane %v926_v31, %v3050_v22 }
 0x380   : > { %v914_v34 = vsel %vm889_vm7, %v913_v29, %v896_v30  ;;  %v915_v35 = vrot.slane %v896_v30, 4  ;;  %v928_v36 = vsel %vm889_vm7, %v912_v18, %v927_v32 }
 0x381   : > { %v920_v37 = vperm.slane %v914_v34, %v3050_v22  ;;  %v936_v38 = vperm.slane %v928_v36, %v3050_v22  ;;  %v941_v39 = vrot.slane %v932_v33, 4  ;;  %v949_v40 = vpack.c.bf16 %v932_v33, %v932_v33  ;;  %v969_v34 = vld [vmem:[#allocation3] sm:$0xf] }
 0x382   : > { %v916_v41 = vsel %vm889_vm7, %v908_v20, %v915_v35 }
 0x383   : > { %v924_v42 = vperm.slane %v916_v41, %v3050_v22  ;;  %v937_v43 = vrot.slane %v920_v37, 4  ;;  %v942_v44 = vsel %vm889_vm7, 0.0, %v941_v39  ;;  %v943_v45 = vrot.slane %v936_v38, 4 }
 0x384   : > { %v945_v46 = vpack.c.bf16 %v920_v37, %v920_v37  ;;  %v950_v47 = vpack.c.bf16 %v942_v44, %v942_v44  ;;  %v951_v48 = vpack.c.bf16 %v936_v38, %v936_v38  ;;  %v990_v49 = vrot.slane %v949_v40, 4 }
 0x385   : > { %v938_v50 = vsel %vm889_vm7, 0.0, %v937_v43  ;;  %v939_v51 = vrot.slane %v924_v42, 4  ;;  %v944_v52 = vsel %vm889_vm7, 0.0, %v943_v45  ;;  %v947_v53 = vpack.c.bf16 %v924_v42, %v924_v42 }
 0x386   : > { %v946_v54 = vpack.c.bf16 %v938_v50, %v938_v50  ;;  %v952_v55 = vpack.c.bf16 %v944_v52, %v944_v52  ;;  %v997_v56 = vrot.slane %v951_v48, 4  ;;  %v1011_v58 = vrot.slane %v950_v47, 4  ;;  %v970_v50 = vld [vmem:[#allocation3 + $0x4] sm:$0xf] }
 0x387   : > { %v940_v57 = vsel %vm889_vm7, 0.0, %v939_v51  ;;  %v992_v60 = vsel %vm889_vm7, %v990_v49, %v945_v46  ;;  %v2712_v37 = vmov -1e+30  }
 0x388   : > { %v948_v59 = vpack.c.bf16 %v940_v57, %v940_v57  ;;  %v998_v61 = vsel %vm889_vm7, %v997_v56, %v947_v53  ;;  %v1017_v62 = vrot.slane %v952_v55, 4  ;;  %v1012_v2 = vsel %vm889_vm7, %v1011_v58, %v946_v54 }
 0x389   : > { %v1002_v63 = vperm.slane %v998_v61, %v3045_v14  ;;  %v996_v4 = vperm.slane %v992_v60, %v3045_v14  ;;  %v1016_v8 = vperm.slane %v1012_v2, %v3045_v14  ;;  %v986_v38 = vsel %vm985_vm10, 0.0, %v2712_v37 }
 0x38a   : > { %v1018_v3 = vsel %vm889_vm7, %v1017_v62, %v948_v59  ;;  %v988_v39 = vperm.slane %v986_v38, 0 }
 0x38b   : > { %v1003_v5 = vrot.slane %v1002_v63, 4  ;;  %v1022_v6 = vperm.slane %v1018_v3, %v3045_v14 }
 0x38d   : > { %v1004_v7 = vsel %vm889_vm7, %v1003_v5, %v996_v4  ;;  %v1023_v9 = vrot.slane %v1022_v6, 4 }
 0x38e   : > { %v1008_v10 = vperm.slane %v1004_v7, %v3050_v22 }
 0x38f   : > { %v1024_v11 = vsel %vm889_vm7, %v1023_v9, %v1016_v8 }
 0x390   : > { %v1009_v12 = vrot.slane %v1008_v10, 4  ;;  %v1028_v13 = vperm.slane %v1024_v11, %v3050_v22  ;;  %v1034_v32 = vshrl.u32 %v1008_v10, 16 }
 0x392   : > { %v1010_v15 = vsel %vm889_vm7, 0, %v1009_v12  ;;  %v1029_v16 = vrot.slane %v1028_v13, 4  ;;  %v1033_v28 = vpack.i.b16 %v1028_v13, %v1008_v10  ;;  %v1035_v29 = vshrl.u32 %v1028_v13, 16 }
 0x393   : > { %v1040_v18 = vshrl.u32 %v1010_v15, 16 }
 0x394   : > { %v1030_v17 = vsel %vm889_vm7, 0, %v1029_v16  ;;  %v1036_v33 = vpack.i.b16 %v1035_v29, %v1034_v32 }
 0x395   : > { %v1041_v19 = vshrl.u32 %v1030_v17, 16  ;;  %v1039_v25 = vpack.i.b16 %v1030_v17, %v1010_v15 }
 0x397   : > { %v1042_v20 = vpack.i.b16 %v1041_v19, %v1040_v18  ;;  %977 = vrot.lane.b32.xlu1 %v969_v34, %s2707_s27 }
 0x3cf   : > { %v1099_v21 = vpop.trf.xlu2 }
 0x3d0   : > { %v1167_v24 = vsel %vm1127_vm8, %v1099_v21, 0 }
 0x3d1   : > { %1176 = vmatpush.bf16.msra.mxu3 %v1167_v24 }
 0x3d4   : > { %2096 = vmatmul.msk.bf16.vlgmr.msra.gmra.mxu3 %vm1123_vm9, %v1039_v25 }
 0x3d5   : > { %973 = vrot.lane.b32.xlu0 %v969_v34, %s2708_s26 }
 0x3e9   : > { %v2328_v26 = vpop.trf.xlu1 }
 0x3ea   : > { %v1129_v27 = vsel %vm1127_vm8, %v2328_v26, 0 }
 0x3eb   : > { %1138 = vmatpush.bf16.msra.mxu1 %v1129_v27 }
 0x3ee   : > { %2094 = vmatmul.msk.bf16.vlgmr.msra.gmra.mxu1 %vm1123_vm9, %v1033_v28 }
 0x3f1   : > { %v2329_v30 = vpop.trf.xlu1 }
 0x3f2   : > { %v1148_v31 = vsel %vm1127_vm8, %v2329_v30, 0 }
 0x3f3   : > { %1157 = vmatpush.bf16.msra.mxu2 %v1148_v31  ;;  %v2155_v31 = vld [vmem:[#allocation3] sm:$0xff] }
 0x3f6   : > { %2095 = vmatmul.msk.bf16.vlgmr.msra.gmra.mxu2 %vm1123_vm9, %v1036_v33 }
 0x409   : > { %v978_v56 = vpop.permute.xlu1 %977 }
 0x40a   : > { %v1258_v24 = vunpack.c.l.b16 %v978_v56 }
 0x413   : > { %v1115_v35 = vpop.trf.xlu0 }
 0x414   : > { %v1186_v36 = vsel %vm1127_vm8, %v1115_v35, 0 }
 0x415   : > { %1195 = vmatpush.bf16.msrb.mxu1 %v1186_v36 }
 0x418   : > { %2097 = vmatmul.msk.bf16.vlgmr.msrb.gmra.mxu1 %vm1123_vm9, %v1042_v20 }
 0x447   : > { %v974_v60 = vpop.permute.xlu0 %973 }
 0x448   : > { %v1256_v30 = vunpack.c.l.b16 %v974_v60 }
 0x457   : > { %v1178_v40 = vpop.f32.mrf.mxu3 }
 0x458   : > { %v1179_v41 = vadd.f32 %v1178_v40, %v988_v39 }
 0x45a   : > { %v1208_v42 = vsel %vm1201_vm11, %v1179_v41, -inf }
 0x45b   : > { %1209 = vmax.xlane.f32.xlu1 %v1208_v42 }
 0x45f   : > { %v1180_v43 = vpop.f32.mrf.mxu3 }
 0x46b   : > { %v1140_v44 = vpop.f32.mrf.mxu1 }
 0x46c   : > { %v1141_v45 = vadd.f32 %v1140_v44, %v988_v39 }
 0x46e   : > { %v1202_v46 = vsel %vm1201_vm11, %v1141_v45, -inf }
 0x46f   : > { %1203 = vmax.xlane.f32.xlu0 %v1202_v46 }
 0x473   : > { %v1142_v47 = vpop.f32.mrf.mxu1 }
 0x479   : > { %v1159_v48 = vpop.f32.mrf.mxu2 }
 0x47a   : > { %v1160_v49 = vadd.f32 %v1159_v48, %v988_v39 }
 0x47c   : > { %v1205_v0 = vsel %vm1201_vm11, %v1160_v49, -inf }
 0x47d   : > { %1206 = vmax.xlane.f32.xlu2 %v1205_v0 }
 0x481   : > { %v1161_v51 = vpop.f32.mrf.mxu2 }
 0x483   : > { %979 = vrot.lane.b32.xlu0 %v970_v50, %s2707_s27  ;;  %s2145_s27 = sshll.u32 %s2684_s20, 3 }
 0x48b   : > { %981 = vrot.lane.b32.xlu0 %v969_v34, %s2709_s9 }
 0x495   : > { %v1197_v52 = vpop.f32.mrf.mxu1  ;;  %975 = vrot.lane.b32.xlu2 %v970_v50, %s2708_s26  ;;  %s3354_s26 = sld [smem:[#allocation45_spill]] }
 0x496   : > { %v1198_v53 = vadd.f32 %v1197_v52, %v988_v39 }
 0x498   : > { %v1211_v54 = vsel %vm1201_vm11, %v1198_v53, -inf }
 0x499   : > { %1212 = vmax.xlane.f32.xlu1 %v1211_v54 }
 0x49d   : > { %v1199_v55 = vpop.f32.mrf.mxu1 }
 0x4b2   : > { %983 = vrot.lane.b32.xlu1 %v970_v50, %s2709_s9  ;;  %s1860_s9 = sadd.s32 %s2680_s1, %s2145_s27 }
 0x4b3   : > { %s2146_s11 = sshll.u32 %s1860_s9, 3 }
 0x4ce   : > { %v1210_v57 = vpop.xlane.xlu1 %1209 }
 0x4cf   : > { %v1216_v58 = vsub.f32 %v1179_v41, %v1210_v57 }
 0x4d1   : > { %v1222_v59 = vmul.f32 1.442695, %v1216_v58 }
 0x4d3   : > { %2362 = vpow2.f32 %v1222_v59 }
 0x4d9   : > { %v2363_v61 = vpop.eup %2362 }
 0x4da   : > { %v1232_v62 = vsel %vm1201_vm11, %v2363_v61, 0.0 }
 0x4dc   : > { %1233 = vadd.xlane.f32.xlu1 %v1232_v62 }
 0x4e2   : > { %v1204_v63 = vpop.xlane.xlu0 %1203 }
 0x4e3   : > { %v1214_v2 = vsub.f32 %v1141_v45, %v1204_v63 }
 0x4e5   : > { %v1218_v3 = vmul.f32 1.442695, %v1214_v2 }
 0x4e7   : > { %2364 = vpow2.f32 %v1218_v3 }
 0x4ed   : > { %v2365_v4 = vpop.eup %2364 }
 0x4ee   : > { %v1226_v5 = vsel %vm1201_vm11, %v2365_v4, 0.0 }
 0x4ef   : > { %1227 = vadd.xlane.f32.xlu2 %v1226_v5 }
 0x4f0   : > { %v1207_v6 = vpop.xlane.xlu2 %1206 }
 0x4f1   : > { %v1215_v7 = vsub.f32 %v1160_v49, %v1207_v6 }
 0x4f3   : > { %v1220_v8 = vmul.f32 1.442695, %v1215_v7 }
 0x4f5   : > { %2366 = vpow2.f32 %v1220_v8  ;;  %v980_v16 = vpop.permute.xlu0 %979 }
 0x4f6   : > { %v1259_v19 = vunpack.c.l.b16 %v980_v16 }
 0x4f8   : > { %v1264_v26 = vpack.c.b16 %v1259_v19, %v1258_v24  ;;  %v976_v28 = vpop.permute.xlu2 %975 }
 0x4f9   : > { %v1257_v29 = vunpack.c.l.b16 %v976_v28 }
 0x4fb   : > { %v2367_v9 = vpop.eup %2366  ;;  %v1263_v32 = vpack.c.b16 %v1257_v29, %v1256_v30 }
 0x4fc   : > { %v1229_v10 = vsel %vm1201_vm11, %v2367_v9, 0.0 }
 0x4fd   : > { %1230 = vadd.xlane.f32.xlu0 %v1229_v10  ;;  %v982_v18 = vpop.permute.xlu0 %981 }
 0x4fe   : > { %v1260_v20 = vunpack.c.l.b16 %v982_v18 }
 0x50c   : > { %v1213_v11 = vpop.xlane.xlu1 %1212 }
 0x50d   : > { %v1217_v12 = vsub.f32 %v1198_v53, %v1213_v11 }
 0x50f   : > { %v1224_v13 = vmul.f32 1.442695, %v1217_v12 }
 0x511   : > { %2368 = vpow2.f32 %v1224_v13 }
 0x517   : > { %v2369_v15 = vpop.eup %2368 }
 0x518   : > { %v1235_v17 = vsel %vm1201_vm11, %v2369_v15, 0.0 }
 0x519   : > { %1236 = vadd.xlane.f32.xlu2 %v1235_v17 }
 0x524   : > { %v984_v21 = vpop.permute.xlu1 %983 }
 0x525   : > { %v1261_v25 = vunpack.c.l.b16 %v984_v21 }
 0x527   : > { %v1265_v27 = vpack.c.b16 %v1261_v25, %v1260_v20 }
 0x529   : > { %2333 = vxpose.binary.xlu0.c.b16.start.end [1/2] (short) (narrow) %v1265_v27, %v1264_v26, 16 }
 0x542   : > { %2330 = vxpose.binary.xlu2.c.b16.start.end [1/2] (short) (narrow) %v1263_v32, %v2155_v31, 16 }
 0x54f   : > { %v1234_v33 = vpop.xlane.xlu1 %1233 }
 0x550   : > { %2370 = vrcp.f32 %v1234_v33 }
 0x556   : > { %v2371_v34 = vpop.eup %2370 }
 0x557   : > { %v1244_v35 = vmul.f32 %v2371_v34, %v2363_v61 }
 0x559   : > { %1248 = vst.msk [vmem:[%s3003_s13 + $0x10] sm:$0xff] %vm1201_vm11, %v1244_v35  ;;  %v1252_v36 = vpack.c.bf16 %v1244_v35, %v1244_v35 }
 0x55b   : > { %v1376_v37 = vsel %vm1201_vm11, %v1252_v36, 0 }
 0x55c   : > { %1385 = vmatpush.bf16.xpose.msrb.mxu0 %v1376_v37 }
 0x562   : > { %v1228_v38 = vpop.xlane.xlu2 %1227 }
 0x563   : > { %2372 = vrcp.f32 %v1228_v38 }
 0x569   : > { %v2373_v39 = vpop.eup %2372 }
 0x56a   : > { %v1242_v40 = vmul.f32 %v2373_v39, %v2365_v4 }
 0x56c   : > { %1246 = vst.msk [vmem:[%s3003_s13] sm:$0xff] %vm1201_vm11, %v1242_v40  ;;  %v1250_v41 = vpack.c.bf16 %v1242_v40, %v1242_v40 }
 0x56e   : > { %v1338_v42 = vsel %vm1201_vm11, %v1250_v41, 0 }
 0x56f   : > { %1347 = vmatpush.bf16.xpose.msrb.mxu2 %v1338_v42 }
 0x570   : > { %v1231_v43 = vpop.xlane.xlu0 %1230 }
 0x571   : > { %2374 = vrcp.f32 %v1231_v43 }
 0x577   : > { %v2375_v44 = vpop.eup %2374 }
 0x578   : > { %v1243_v45 = vmul.f32 %v2375_v44, %v2367_v9 }
 0x57a   : > { %1247 = vst.msk [vmem:[%s3003_s13 + $0x8] sm:$0xff] %vm1201_vm11, %v1243_v45  ;;  %v1251_v46 = vpack.c.bf16 %v1243_v45, %v1243_v45 }
 0x57c   : > { %v1357_v47 = vsel %vm1201_vm11, %v1251_v46, 0 }
 0x57d   : > { %1366 = vmatpush.bf16.xpose.msrb.mxu3 %v1357_v47 }
 0x58c   : > { %v1237_v48 = vpop.xlane.xlu2 %1236 }
 0x58d   : > { %2376 = vrcp.f32 %v1237_v48 }
 0x593   : > { %v2377_v49 = vpop.eup %2376 }
 0x594   : > { %v1245_v0 = vmul.f32 %v2377_v49, %v2369_v15 }
 0x596   : > { %1249 = vst.msk [vmem:[%s3003_s13 + $0x18] sm:$0xff] %vm1201_vm11, %v1245_v0  ;;  %v1253_v50 = vpack.c.bf16 %v1245_v0, %v1245_v0 }
 0x598   : > { %v1395_v51 = vsel %vm1201_vm11, %v1253_v50, 0 }
 0x599   : > { %1404 = vmatpush.bf16.xpose.msra.mxu1 %v1395_v51 }
 0x5d5   : > { %v2334_v52 = vpop.trf.xlu0 }
 0x5d6   : > { %2104 = vmatmul.msk.bf16.vlgmr.msrb.gmra.mxu0 %vm1201_vm11, %v2334_v52 }
 0x5dd   : > { %v2335_v53 = vpop.trf.xlu0 }
 0x5de   : > { %2105 = vmatmul.msk.bf16.vlgmr.msra.gmra.mxu1 %vm1201_vm11, %v2335_v53 }
 0x5e3   : > { %v2331_v54 = vpop.trf.xlu2 }
 0x5e4   : > { %2102 = vmatmul.msk.bf16.vlgmr.msrb.gmra.mxu2 %vm1201_vm11, %v2331_v54 }
 0x5eb   : > { %v2332_v55 = vpop.trf.xlu2 }
 0x5ec   : > { %2103 = vmatmul.msk.bf16.vlgmr.msrb.gmra.mxu3 %vm1201_vm11, %v2332_v55 }
 0x653   : > { %v1387_v56 = vpop.f32.mrf.mxu0 }
 0x65b   : > { %v1389_v57 = vpop.f32.mrf.mxu0  ;;  %v1406_v58 = vpop.f32.mrf.mxu1 }
 0x663   : > { %v1408_v59 = vpop.f32.mrf.mxu1 }
 0x667   : > { %v1349_v60 = vpop.f32.mrf.mxu2 }
 0x668   : > { %v2336_v61 = vpack.i.bf16 %v1349_v60, %v1387_v56 }
 0x66a   : > { %2337 = vxpose.xlu1.b32.start.end [1/1] (short) (narrow) %v2336_v61, 8 }
 0x66f   : > { %v1351_v62 = vpop.f32.mrf.mxu2  ;;  %v1368_v63 = vpop.f32.mrf.mxu3 }
 0x670   : > { %v2343_v2 = vpack.i.bf16 %v1368_v63, %v1406_v58 }
 0x672   : > { %2344 = vxpose.xlu2.b32.start.end [1/1] (short) (narrow) %v2343_v2, 8 }
 0x677   : > { %v1370_v3 = vpop.f32.mrf.mxu3 }
 0x70b   : > { %v2345_v4 = vpop.trf.xlu2 }
 0x70c   : > { %v2349_v5 = vunpack.i.h.bf16 %v2345_v4  ;;  %v2346_v6 = vunpack.i.l.bf16 %v2345_v4 }
 0x70e   : > { %v2338_v7 = vpop.trf.xlu1  ;;  %v1552_v8 = vrot.slane %v2349_v5, 4  ;;  %v1550_v9 = vrot.slane %v2346_v6, 4 }
 0x70f   : > { %v2342_v10 = vunpack.i.h.bf16 %v2338_v7  ;;  %v2339_v11 = vunpack.i.l.bf16 %v2338_v7 }
 0x710   : > { %v1551_v12 = vsel %vm889_vm7, %v1550_v9, %v2349_v5  ;;  %v1553_v13 = vsel %vm889_vm7, %v2346_v6, %v1552_v8 }
 0x711   : > { %v1540_v15 = vrot.slane %v2342_v10, 4  ;;  %v1538_v16 = vrot.slane %v2339_v11, 4  ;;  %v1557_v17 = vperm.slane %v1551_v12, %v3045_v14  ;;  %v1561_v18 = vperm.slane %v1553_v13, %v3045_v14 }
 0x713   : > { %v1539_v19 = vsel %vm889_vm7, %v1538_v16, %v2342_v10  ;;  %v1541_v20 = vsel %vm889_vm7, %v2339_v11, %v1540_v15  ;;  %v1562_v21 = vrot.slane %v1557_v17, 4  ;;  %v1574_v24 = vrot.slane %v1561_v18, 4  ;;  %v2156_v11 = vld [vmem:[#allocation10] sm:$0xff] }
 0x714   : > { %v1545_v25 = vperm.slane %v1539_v19, %v3045_v14  ;;  %v1549_v26 = vperm.slane %v1541_v20, %v3045_v14  ;;  %v2353_v20 = vld [vmem:[%s3353_s5] ss:$0 sm:$0xff]  ;;  %s3357_s5 = sld [smem:[#allocation44_spill]] }
 0x716   : > { %v1564_v27 = vrot.slane %v1545_v25, 4  ;;  %v1576_v28 = vrot.slane %v1549_v26, 4  ;;  %v1563_v29 = vsel %vm889_vm7, %v1562_v21, %v1545_v25  ;;  %v1575_v30 = vsel %vm889_vm7, %v1574_v24, %v1549_v26 }
 0x717   : > { %v1569_v31 = vperm.slane %v1563_v29, %v3050_v22  ;;  %v1581_v32 = vperm.slane %v1575_v30, %v3050_v22 }
 0x718   : > { %v1565_v33 = vsel %vm889_vm7, %v1557_v17, %v1564_v27  ;;  %v1577_v34 = vsel %vm889_vm7, %v1561_v18, %v1576_v28 }
 0x719   : > { %v1573_v35 = vperm.slane %v1565_v33, %v3050_v22  ;;  %v1585_v36 = vperm.slane %v1577_v34, %v3050_v22  ;;  %v1586_v37 = vrot.slane %v1569_v31, 4  ;;  %v1590_v39 = vrot.slane %v1581_v32, 4  ;;  %v2159_v33 = vld [vmem:[#allocation12 + $0x8] sm:$0xff]  ;;  %v2158_v34 = vld [vmem:[#allocation12] sm:$0xff] }
 0x71a   : > { %1764 = vmatpush.bf16.msra.mxu3 %v2159_v33 }
 0x71b   : > { %v1588_v38 = vrot.slane %v1573_v35, 4  ;;  %v1592_v40 = vrot.slane %v1585_v36, 4  ;;  %v1587_v49 = vsel %vm889_vm7, 0.0, %v1586_v37  ;;  %v1591_v0 = vsel %vm889_vm7, 0.0, %v1590_v39  ;;  %v2162_v37 = vld [vmem:[%s3354_s26 + $0x10] sm:$0xff] }
 0x71d   : > { %v1589_v41 = vsel %vm889_vm7, 0.0, %v1588_v38  ;;  %v1593_v42 = vsel %vm889_vm7, 0.0, %v1592_v40  ;;  %v1594_v43 = vsel %vm889_vm7, %v1588_v38, %v1569_v31  ;;  %v1605_v44 = vsel %vm889_vm7, %v1592_v40, %v1581_v32 }
 0x71e   : > { %v1599_v45 = vrot.slane %v1589_v41, 4  ;;  %v1598_v46 = vperm.slane %v1594_v43, %v3045_v14  ;;  %v1609_v47 = vperm.slane %v1605_v44, %v3045_v14  ;;  %v1610_v48 = vrot.slane %v1593_v42, 4  ;;  %1765 = vmatpush.bf16.msra.mxu3 %v2158_v34 }
 0x720   : > { %v1600_v50 = vsel %vm889_vm7, %v1599_v45, %v1587_v49  ;;  %v1611_v51 = vsel %vm889_vm7, %v1610_v48, %v1591_v0  ;;  %v1618_v52 = vrot.slane %v1598_v46, 4  ;;  %v1630_v53 = vrot.slane %v1609_v47, 4 }
 0x721   : > { %v1604_v54 = vperm.slane %v1600_v50, %v3045_v14  ;;  %v1615_v55 = vperm.slane %v1611_v51, %v3045_v14  ;;  %v2161_v50 = vld [vmem:[%s3354_s26 + $0x8] sm:$0xff]  ;;  %v2160_v51 = vld [vmem:[%s3354_s26] sm:$0xff] }
 0x723   : > { %v1616_v56 = vrot.slane %v1604_v54, 4  ;;  %v1628_v57 = vrot.slane %v1615_v55, 4  ;;  %v1619_v58 = vsel %vm889_vm7, %v1604_v54, %v1618_v52  ;;  %v1631_v59 = vsel %vm889_vm7, %v1615_v55, %v1630_v53  ;;  %v2356_v52 = vld [vmem:[%s3357_s5] ss:$0 sm:$0xff] }
 0x724   : > { %v1627_v60 = vperm.slane %v1619_v58, %v3050_v22  ;;  %v1639_v61 = vperm.slane %v1631_v59, %v3050_v22 }
 0x725   : > { %v1617_v62 = vsel %vm889_vm7, %v1616_v56, %v1598_v46  ;;  %v1629_v63 = vsel %vm889_vm7, %v1628_v57, %v1609_v47  ;;  %v2355_v47 = vld [vmem:[%s3356_s15] ss:$0 sm:$0xff] }
 0x726   : > { %v1623_v2 = vperm.slane %v1617_v62, %v3050_v22  ;;  %v1635_v3 = vperm.slane %v1629_v63, %v3050_v22  ;;  %v1646_v4 = vrot.slane %v1627_v60, 4  ;;  %v1644_v14 = vrot.slane %v1639_v61, 4  ;;  %v2157_v22 = vld [vmem:[#allocation10 + $0x8] sm:$0xff] }
 0x727   : > { %1694 = vmatpush.bf16.msra.mxu2 %v2157_v22 }
 0x728   : > { %v1640_v5 = vrot.slane %v1635_v3, 4  ;;  %v1642_v6 = vrot.slane %v1623_v2, 4  ;;  %v1647_v7 = vsel %vm889_vm7, %v1639_v61, %v1646_v4  ;;  %v1645_v8 = vsel %vm889_vm7, %v1644_v14, %v1627_v60 }
 0x729   : > { %1657 = vrot.lane.b32.xlu1 %v1647_v7, %s2713_s21  ;;  %1653 = vrot.lane.b32.xlu2 %v1645_v8, %s2714_s4 }
 0x72a   : > { %v1643_v9 = vsel %vm889_vm7, %v1635_v3, %v1642_v6  ;;  %v1641_v10 = vsel %vm889_vm7, %v1640_v5, %v1623_v2 }
 0x72b   : > { %1649 = vrot.lane.b32.xlu0 %v1643_v9, %s2715_s6  ;;  %1695 = vmatpush.bf16.msra.mxu2 %v2156_v11 }
 0x783   : > { %v1654_v13 = vpop.permute.xlu2 %1653 }
 0x79b   : > { %v1658_v16 = vpop.permute.xlu1 %1657 }
 0x79d   : > { %v1650_v12 = vpop.permute.xlu0 %1649 }
 0x79e   : > { %v1660_v15 = vsel %vm1123_vm9, %v1641_v10, %v1650_v12 }
 0x79f   : > { %v1661_v17 = vsel %vm1201_vm11, %v1660_v15, %v1654_v13 }
 0x7a0   : > { %v1663_v18 = vsel %vm1662_vm12, %v1661_v17, %v1658_v16 }
 0x7a1   : > { %v1664_v19 = vpack.c.bf16 %v1663_v18, %v1663_v18 }
 0x7a3   : > { %2114 = vmatmul.msk.bf16.vlgmr.msra.gmra.mxu2 %vm803_vm2, %v1664_v19 }
 0x826   : > { %v1697_v21 = vpop.f32.mrf.mxu2 }
 0x827   : > { %v1698_v24 = vadd.f32 %v2353_v20, %v1697_v21 }
 0x829   : > { %v3169_v25 = vadd.f32 %v1698_v24, %v2999_v1  ;;  %v2163_v1 = vld [vmem:[%s3354_s26 + $0x18] sm:$0xff] }
 0x82a   : > { %1817 = vmatpush.bf16.msra.mxu0 %v2163_v1 }
 0x82b   : > { %v1704_v26 = vsel %vm803_vm2, %v3169_v25, 0.0 }
 0x82c   : > { %1705 = vadd.xlane.f32.xlu0 %v1704_v26 }
 0x82e   : > { %v1699_v27 = vpop.f32.mrf.mxu2  ;;  %1818 = vmatpush.bf16.msra.mxu0 %v2162_v37 }
 0x832   : > { %1819 = vmatpush.bf16.msra.mxu0 %v2161_v50 }
 0x836   : > { %1820 = vmatpush.bf16.msra.mxu0 %v2160_v51 }
 0x89f   : > { %v1706_v28 = vpop.xlane.xlu0 %1705 }
 0x8a0   : > { %v1707_v29 = vmul.f32 %v1706_v28, %v3013_v23 }
 0x8a2   : > { %v1708_v30 = vsub.f32 %v3169_v25, %v1707_v29 }
 0x8a4   : > { %v1709_v31 = vmul.f32 %v1708_v30, %v1708_v30 }
 0x8a6   : > { %v1710_v32 = vsel %vm803_vm2, %v1709_v31, 0.0 }
 0x8a7   : > { %1711 = vadd.xlane.f32.xlu1 %v1710_v32 }
 0x91a   : > { %v1712_v35 = vpop.xlane.xlu1 %1711 }
 0x91b   : > { %v1713_v36 = vmul.f32 %v1712_v35, %v3013_v23  ;;  %v2354_v23 = vld [vmem:[%s3355_s16] ss:$0 sm:$0xff]  ;;  %s3359_s16 = sld [smem:[#allocation48_spill]] }
 0x91d   : > { %v1714_v38 = vadd.f32 1e-05, %v1713_v36 }
 0x91f   : > { %2378 = vrsqrt.f32 %v1714_v38  ;;  %vm1721_vm14 = vweird.f32 %v1714_v38 }
 0x921   : > { %s1862_s10 = scalar_lea.hbm %s3359_s16, %s2146_s11  ;;  %s2550_s7 = scalar_lea.hbm %s3359_s16, 128 }
 0x922   : > { %s1865_s15 = sshll.u32 %s1862_s10, 4  ;;  %s1866_s15 = int_to_ptr.hbm [resolvable:$true] %s1865_s15 }
 0x923   : > { %s2544_s24 = sshra.s32 %s1866_s15, 4  ;;  %s2545_s24 = int_to_ptr.hbm [resolvable:$true] %s2544_s24 }
 0x924   : > { %s2546_s21 = scalar_lea.hbm %s2545_s24, 32  ;;  %p2551_p5 = scmp.lt.s32.totalorder %s2545_s24, %s3359_s16 }
 0x925   : > { %v2379_v39 = vpop.eup %2378  ;;  %p2547_p3 = scmp.ne.s32.totalorder %s2545_s24, %s2546_s21  ;;  %p2552_p6 = scmp.lt.s32.totalorder %s2550_s7, %s2546_s21 }
 0x926   : > { %v1716_v40 = vmul.f32 %v2379_v39, %v1714_v38  ;;  %vm1722_vm13 = vweird.f32 %v2379_v39 }
 0x927   : > { %vm1723_vm15 = vmor %vm1721_vm14, %vm1722_vm13  ;;  %p2548_p2 = pnand %p2547_p3, %p2884_p7  ;;  %p2553_p8 = por %p2552_p6, %p2551_p5 }
 0x928   : > { %v1717_v41 = vmul.f32 %v2379_v39, %v1716_v40 }
 0x929   : > { %p2549_p4 = pneg %p2548_p2 }
 0x92a   : > { %v1718_v42 = vmul.f32 0.5, %v1717_v41 }
 0x92b   : > { %p2554_p10 = pnand %p2553_p8, %p2549_p4 }
 0x92c   : > { %v1719_v43 = vsub.f32 1.5, %v1718_v42 }
 0x92e   : > { %v1720_v44 = vmul.f32 %v2379_v39, %v1719_v43 }
 0x930   : > { %v1724_v45 = vsel %vm1723_vm15, %v2379_v39, %v1720_v44 }
 0x931   : > { %v1725_v46 = vmul.f32 %v1724_v45, %v1708_v30 }
 0x933   : > { %v1729_v48 = vmul.f32 %v2354_v23, %v1725_v46 }
 0x935   : > { %v1733_v49 = vadd.f32 %v2355_v47, %v1729_v48 }
 0x937   : > { %v1734_v0 = vpack.c.bf16 %v1733_v49, %v1733_v49 }
 0x939   : > { %2123 = vmatmul.msk.bf16.vlgmr.msra.gmra.mxu3 %vm803_vm2, %v1734_v0 }
 0x9bc   : > { %v1767_v53 = vpop.f32.mrf.mxu3 }
 0x9bd   : > { %v1768_v54 = vadd.f32 %v2356_v52, %v1767_v53 }
 0x9bf   : > { %v1771_v55 = vmax.f32 %v1768_v54, 0.0 }
 0x9c1   : > { %v1772_v56 = vpack.c.bf16 %v1771_v55, %v1771_v55 }
 0x9c3   : > { %2140 = vmatmul.msk.bf16.vlgmr.msra.gmra.mxu0 %vm1809_vm0, %v1772_v56 }
 0x9c4   : > { %v1769_v57 = vpop.f32.mrf.mxu3 }
 0x9c5   : > { %2557 = shalt.err (!%p2554_p10)
}
 0x9c6   : > { %s2716_s13 = smov 128   ;;  %s2717_s9 = smov 256  }
 0x9c7   : > { %2181 = dma.vmem_to_hbm [thread:$0]  (%p2884_p7), %s1864_s23, 512, %s1866_s15, %s1834_s17, %s2716_s13, %s2717_s9, %s2715_s6  }
 0x9c8   : > { %s2143_s11 = sshll.u32 %s2684_s20, 1  ;;  %s3360_s21 = sld [smem:[#allocation46_spill]] }
 0x9c9   : > { %s1844_s25 = sadd.s32 %s2680_s1, %s2143_s11  ;;  %s3361_s7 = sld [smem:[#allocation47_spill]] }
 0x9ca   : > { %s2144_s30 = sshll.u32 %s1844_s25, 3  ;;  %s1848_s27 = sshll.u32 %s3001_s12, 4  ;;  %s1849_s27 = int_to_ptr.vmem [resolvable:$true] %s1848_s27 }
 0x9cb   : > { %s1829_s1 = scalar_lea.sflag [#allocation6], %s2988_s14 }
 0x9ce   : > { %v2357_v58 = vld [vmem:[%s3360_s21] ss:$0 sm:$0xff] }
 0x9cf   : > { %s1846_s5 = scalar_lea.hbm %s3361_s7, %s2144_s30  ;;  %s2578_s17 = scalar_lea.hbm %s3361_s7, 32 }
 0x9d0   : > { %s1850_s3 = sshll.u32 %s1846_s5, 4  ;;  %s1851_s3 = int_to_ptr.hbm [resolvable:$true] %s1850_s3 }
 0x9d1   : > { %s2572_s20 = sshra.s32 %s1851_s3, 4  ;;  %s2573_s20 = int_to_ptr.hbm [resolvable:$true] %s2572_s20 }
 0x9d2   : > { %s2574_s6 = scalar_lea.hbm %s2573_s20, 8  ;;  %p2579_p0 = scmp.lt.s32.totalorder %s2573_s20, %s3361_s7 }
 0x9d3   : > { %p2575_p12 = scmp.ne.s32.totalorder %s2573_s20, %s2574_s6  ;;  %p2580_p1 = scmp.lt.s32.totalorder %s2578_s17, %s2574_s6 }
 0x9d5   : > { %p2576_p13 = pnand %p2575_p12, %p2884_p7  ;;  %p2581_p3 = por %p2580_p1, %p2579_p0 }
 0x9d7   : > { %p2577_p11 = pneg %p2576_p13 }
 0x9d9   : > { %p2582_p2 = pnand %p2581_p3, %p2577_p11 }
 0xa40   : > { %v1822_v59 = vpop.f32.mrf.mxu0 }
 0xa41   : > { %v1823_v60 = vadd.f32 %v2357_v58, %v1822_v59 }
 0xa43   : > { %v1826_v61 = vadd.f32 %v1823_v60, %v3169_v25 }
 0xa45   : > { %1827 = vst.msk [vmem:[%s3001_s12] sm:$0xff] %vm803_vm2, %v1826_v61 }
 0xa46   : > { %2585 = shalt.err (!%p2582_p2)
}
 0xa47   : > { %2180 = dma.vmem_to_hbm [thread:$0]  (%p2884_p7), %s1849_s27, 128, %s1851_s3, %s1829_s1  }
 0xa48   : > { %v1824_v62 = vpop.f32.mrf.mxu0 }
 0xa49 PF: > { %s3362_s14 = sld [smem:[#allocation22_spill]]  ;;  %p2215_p4 = scmp.ge.s32.totalorder %s2696_s2, 2 }
 0xa4b   : > { %p2202_p5 = pnand %p2215_p4, %p2889_p9 }
 0xa4d   : > { %p2203_p6 = pneg %p2202_p5 }
 0xa4f   : > { %s1880_s11 = sand.u32 1, %s3362_s14  }
 0xa50   : > { %s1881_s25 = scalar_lea.sflag [#allocation6], %s1880_s11 }
 0xa51   : > { %2647 = dma.done.wait (%p2203_p6), %s1881_s25, 128  }
 0xa52   : > { %2649 = vsyncadd (%p2203_p6), %s1881_s25, 4294967168  ;;  %s1891_s30 = scalar_lea.sflag [#allocation15], %s1880_s11 }
 0xa53   : > { %2651 = dma.done.wait (%p2203_p6), %s1891_s30, 512  }
 0xa54   : > { %2653 = vsyncadd (%p2203_p6), %s1891_s30, 4294966784  ;;  %s42_s2 = sadd.s32 1, %s2696_s2   ;;  %s3364_s3 = sld [smem:[#allocation30_spill]] }
 0xa55   : > { %p39_p8 = scmp.ge.s32.totalorder %s42_s2, 6   ;;  %s3365_s19 = sld [smem:[#allocation23_spill]] }
 0xa56   : > { %s3366_s10 = sld [smem:[#allocation29_spill]]  ;;  %s3370_s27 = smov %s2660_s28 }
 0xa57   : > { %s3367_s1 = sld [smem:[#allocation24_spill]]  ;;  %s3371_s28 = smov %s2664_s29 }
 0xa58   : > { %s3368_s21 = sld [smem:[#allocation27_spill]]  ;;  %s3373_s30 = smov %s2672_s0 }
 0xa59   : > { %s3369_s24 = sld [smem:[#allocation28_spill]]  ;;  %s3376_s20 = smov %s2692_s22 }
 0xa5a   : > { %s3372_s29 = smov %s3364_s3 }
 0xa5b   : > { %s3374_s0 = smov %s3365_s19  ;;  %41 = sbr.rel (!%p39_p8) target bundleno = 33 (0x21), region = 182 }
 0xa5c   : > { %s3375_s19 = smov %s3366_s10 }
 0xa5f   : > { %s3377_s22 = smov %s3369_s24 }
 0xa60   :  { %1897 = vsyncpa [#allocation5], 1 }
 0xa61   :  { %1899 = vsyncpa [#allocation5 + $0x1], 1 }
 0xa62   :  { %1900 = vsyncpa [#allocation8], 1 }
 0xa63   :  { %1902 = vsyncpa [#allocation8 + $0x1], 1 }
 0xa64   :  { %1903 = vsyncpa [#allocation11], 1 }
 0xa65   :  { %1904 = vsyncpa [#allocation6], 1 }
 0xa66   :  { %1906 = vsyncpa [#allocation6 + $0x1], 1 }
 0xa67   :  { %1907 = vsyncpa [#allocation15], 1 }
 0xa68   :  { %1909 = vsyncpa [#allocation15 + $0x1], 1 }

</bundles_post_ra>
